<compile_context>
chip_gen: v7x
topology: tpu7x:2x2x1
jax: 0.10.0
libtpu: 0.0.40
codegen_flags: <defaults>
</compile_context>

<pallas_src>
import functools

import numpy as np
import jax
import jax.numpy as jnp
from jax.experimental import pallas as pl
from jax.experimental.pallas import tpu as pltpu


# ----------------------------------------------------------------------------- #
# Fused labels + boxes kernel
# ----------------------------------------------------------------------------- #
def _fused_kernel(logits_ref, lb_ref, tgt_cls_ref, tgt_b_ref, w_ref,
                  sbox_ref, tbox_ref, bmask_ref, out_ref,
                  *, true_label, false_label, eos_coef, focal_alpha):
    """Per grid-block partial sums for the UCF criterion.

    logits   : [TN, Q, C]  bf16 action-class logits (block of N = bs*T rows)
    lb       : [3, TN, Q]  bf16 binary-head logits split into 3 lane-dense planes
    tgt_cls  : [TN, Q]     int32 action targets in [0, C]  (C == no-object)
    tgt_b    : [TN, Q]     int32 binary targets in {0,1,2}; 3 == padded row
    w        : [TN, Q]     f32 focal weights (0 on padded rows)
    sbox/tbox: [4, M_pad]  f32 matched src/target boxes (cx,cy,w,h), channel-on-sublane
    bmask    : [1, M_pad]  f32 validity mask for matched boxes
    out      : [8, 128]    f32; sublane 0 lanes 0..4 = (focal, ceb_num, ceb_den, l1, giou)
    """
    f32 = jnp.float32
    logits = logits_ref[...].astype(f32)            # [TN, Q, C]
    p0 = lb_ref[0].astype(f32)                      # [TN, Q]
    p1 = lb_ref[1].astype(f32)
    p2 = lb_ref[2].astype(f32)
    tgt_cls = tgt_cls_ref[...]
    tgt_b = tgt_b_ref[...]
    w = w_ref[...]

    # ----- binary head: 3-way softmax + weighted cross-entropy (loss_ce_b) -----
    m = jnp.maximum(jnp.maximum(p0, p1), p2)
    e0 = jnp.exp(p0 - m)
    e1 = jnp.exp(p1 - m)
    e2 = jnp.exp(p2 - m)
    ssum = e0 + e1 + e2
    prob_fg = e1 * pl.reciprocal(ssum, approx=True)          # softmax(logits_b)[..., 1]
    log_s = jnp.log(ssum)
    l_sel = jnp.where(tgt_b == 0, p0, jnp.where(tgt_b == 1, p1, p2))
    logp_sel = (l_sel - m) - log_s                            # log-softmax at target class
    valid_b = (tgt_b <= 2).astype(f32)                        # 0 on padded rows
    w_sel = jnp.where(tgt_b == 2, eos_coef, 1.0) * valid_b    # empty_weight_b gather
    ceb_num = jnp.sum(-w_sel * logp_sel)
    ceb_den = jnp.sum(w_sel)

    # ----- focal loss on p = clip(prob_fg * sigmoid(logits), eps, 1-eps) -----
    # The reference's inverse_sigmoid -> sigmoid round trip is the identity on the
    # clipped probability, so BCE-with-logits reduces to -(t*log p + (1-t)*log(1-p)).
    # TODO(synk): exact external `sigmoid_focal_loss` not given; standard DETR form
    #             assumed (alpha=0.25, gamma=2, loss*weights, mean over queries outside).
    eps = 1e-5
    p = prob_fg[:, :, None] * jax.nn.sigmoid(logits)
    p = jnp.clip(p, eps, 1.0 - eps)
    log_p = jnp.log(p)
    log_1mp = jnp.log(1.0 - p)
    cls_iota = jax.lax.broadcasted_iota(jnp.int32, logits.shape, 2)
    is_tgt = tgt_cls[:, :, None] == cls_iota                  # last class implicitly dropped
    t = jnp.where(is_tgt, true_label, false_label)            # smoothed one-hot, built in-kernel
    ce = -(t * log_p + (1.0 - t) * log_1mp)
    p_t = p * t + (1.0 - p) * (1.0 - t)
    one_m_pt = 1.0 - p_t
    alpha_t = focal_alpha * t + (1.0 - focal_alpha) * (1.0 - t)
    focal = jnp.sum(alpha_t * ce * one_m_pt * one_m_pt * w[:, :, None])

    # ----- matched boxes: L1 + (1 - GIoU); only the first grid block contributes -----
    sb = sbox_ref[...]                                         # [4, M_pad]
    tb = tbox_ref[...]
    bm = bmask_ref[...]                                        # [1, M_pad]
    l1_sum = jnp.sum(jnp.abs(sb - tb) * bm)

    def _xyxy(b):
        cx, cy, bw, bh = b[0:1], b[1:2], b[2:3], b[3:4]
        return cx - 0.5 * bw, cy - 0.5 * bh, cx + 0.5 * bw, cy + 0.5 * bh

    sx0, sy0, sx1, sy1 = _xyxy(sb)
    tx0, ty0, tx1, ty1 = _xyxy(tb)
    area_s = (sx1 - sx0) * (sy1 - sy0)
    area_t = (tx1 - tx0) * (ty1 - ty0)
    inter = (jnp.maximum(jnp.minimum(sx1, tx1) - jnp.maximum(sx0, tx0), 0.0)
             * jnp.maximum(jnp.minimum(sy1, ty1) - jnp.maximum(sy0, ty0), 0.0))
    union = area_s + area_t - inter
    inv_union = pl.reciprocal(jnp.maximum(union, 1e-7), approx=True)   # eps-clamped: no NaN
    iou = inter * inv_union
    area_c = (jnp.maximum(jnp.maximum(sx1, tx1) - jnp.minimum(sx0, tx0), 0.0)
              * jnp.maximum(jnp.maximum(sy1, ty1) - jnp.minimum(sy0, ty0), 0.0))
    inv_c = pl.reciprocal(jnp.maximum(area_c, 1e-7), approx=True)
    giou = iou - (area_c - union) * inv_c
    giou_sum = jnp.sum((1.0 - giou) * bm)

    is_first = jnp.where(pl.program_id(0) == 0, 1.0, 0.0)     # boxes counted once
    l1_sum = l1_sum * is_first
    giou_sum = giou_sum * is_first

    # ----- pack the 5 partial sums into sublane 0 of a lane-dense (8,128) row -----
    sub = jax.lax.broadcasted_iota(jnp.int32, (8, 128), 0)
    lane = jax.lax.broadcasted_iota(jnp.int32, (8, 128), 1)
    row0 = (sub == 0).astype(f32)
    out_ref[...] = row0 * (focal * (lane == 0).astype(f32)
                           + ceb_num * (lane == 1).astype(f32)
                           + ceb_den * (lane == 2).astype(f32)
                           + l1_sum * (lane == 3).astype(f32)
                           + giou_sum * (lane == 4).astype(f32))


def _choose_tn(n, q, c, budget_bytes=12 << 20, cap=256):
    """Block size over N=bs*T. Double-buffered blocks stay well under the 32 MiB scoped
    VMEM of v7x (v5e/v6e have 128 MiB so this is conservative there)."""
    per_row = q * c * 2 + 3 * q * 2 + 2 * q * 4 + q * 4   # bf16 logits + bf16 planes + 2*int32 + f32
    tn = cap
    while tn > 16 and tn * per_row > budget_bytes:
        tn //= 2
    tn = max(16, tn)
    n16 = -(-n // 16) * 16
    return min(tn, n16)                                    # multiple of 16 (bf16 sublane tile)


@functools.lru_cache(maxsize=None)
def _build_fused_call(n_pad, tn, q, c, m_pad, true_label, false_label, eos_coef, focal_alpha):
    g = n_pad // tn
    kernel = functools.partial(_fused_kernel, true_label=true_label, false_label=false_label,
                               eos_coef=eos_coef, focal_alpha=focal_alpha)
    return pl.pallas_call(
        kernel,
        out_shape=jax.ShapeDtypeStruct((8 * g, 128), jnp.float32),
        grid=(g,),
        in_specs=[
            pl.BlockSpec((tn, q, c), lambda i: (i, 0, 0)),   # logits (bf16)
            pl.BlockSpec((3, tn, q), lambda i: (0, i, 0)),   # logits_b planes (bf16)
            pl.BlockSpec((tn, q), lambda i: (i, 0)),         # target classes (int32)
            pl.BlockSpec((tn, q), lambda i: (i, 0)),         # target classes _b (int32)
            pl.BlockSpec((tn, q), lambda i: (i, 0)),         # focal weights (f32)
            pl.BlockSpec((4, m_pad), lambda i: (0, 0)),      # matched src boxes (f32)
            pl.BlockSpec((4, m_pad), lambda i: (0, 0)),      # matched tgt boxes (f32)
            pl.BlockSpec((1, m_pad), lambda i: (0, 0)),      # box validity mask (f32)
        ],
        out_specs=pl.BlockSpec((8, 128), lambda i: (i, 0)),  # per-block partial sums
        compiler_params=pltpu.CompilerParams(
            dimension_semantics=("parallel",),               # per-block partials -> both v7x TCs
            vmem_limit_bytes=32 * 1024 * 1024),
    )


# ----------------------------------------------------------------------------- #
# Cardinality kernel (logging only; T-reduction done inside, no [N,Q] HBM round trip)
# ----------------------------------------------------------------------------- #
def _cardinality_kernel(logits_ref, card_ref):
    """logits: [bs*Q, T, C]; card: [bs*Q, 1] = sum_T (argmax(-1) != C-1)."""
    logits = logits_ref[...].astype(jnp.float32)
    c = logits.shape[-1]
    m = jnp.max(logits, axis=-1, keepdims=True)
    idx = jax.lax.broadcasted_iota(jnp.int32, logits.shape, 2)
    first_max = jnp.min(jnp.where(logits == m, idx, c), axis=-1)      # [bs*Q, T]
    notlast = (first_max != (c - 1)).astype(jnp.float32)
    card_ref[...] = jnp.sum(notlast, axis=-1, keepdims=True)          # [bs*Q, 1]


@functools.lru_cache(maxsize=None)
def _build_cardinality_call(bq, t, c):
    return pl.pallas_call(
        _cardinality_kernel,
        out_shape=jax.ShapeDtypeStruct((bq, 1), jnp.float32),
        in_specs=[pl.BlockSpec(memory_space=pltpu.MemorySpace.VMEM)],
        out_specs=pl.BlockSpec(memory_space=pltpu.MemorySpace.VMEM),
    )


def _pad_axis(x, target, axis=0):
    n = x.shape[axis]
    if n == target:
        return x
    pad = [(0, 0)] * x.ndim
    pad[axis] = (0, target - n)
    return jnp.pad(x, pad)


# ----------------------------------------------------------------------------- #
# Criterion (host glue mirrors the PyTorch reference)
# ----------------------------------------------------------------------------- #
class SetCriterionUCFPallas:
    def __init__(self, weight, num_classes, num_queries, matcher, weight_dict,
                 eos_coef, losses, data_file=None, evaluation=False,
                 label_smoothing_alpha=0.1):
        self.weight = float(weight)
        self.evaluation = evaluation
        self.num_classes = int(num_classes)
        self.num_queries = int(num_queries)
        self.matcher = matcher
        self.weight_dict = weight_dict
        self.eos_coef = float(eos_coef)
        self.losses = losses
        self.data_file = data_file
        self.label_smoothing_alpha = label_smoothing_alpha
        # buffers kept for parity with the torch module (folded into the kernel)
        self.empty_weight = np.ones(self.num_classes + 1, np.float32)
        self.empty_weight[-1] = self.eos_coef
        self.empty_weight_b = np.ones(3, np.float32)
        self.empty_weight_b[-1] = self.eos_coef

    # --- helpers -------------------------------------------------------------
    @staticmethod
    def _get_src_permutation_idx(indices):
        batch_idx = np.concatenate([np.full_like(src, i) for i, (src, _) in enumerate(indices)])
        src_idx = np.concatenate([src for src, _ in indices])
        return batch_idx.astype(np.int32), src_idx.astype(np.int32)

    @staticmethod
    def _tslice(targets):
        fp = int(targets[0]['front_pad'])
        ep = -int(targets[0]['end_pad'])
        return fp, slice(fp, ep if ep != 0 else None)

    def _smoothing(self):
        if self.label_smoothing_alpha:
            a = self.label_smoothing_alpha
            return (1.0 - a) + a / self.num_classes, a / self.num_classes
        return 1.0, 0.0

    # --- fused labels + boxes ------------------------------------------------
    def _fused_losses(self, outputs, targets, indices, *, need_labels, need_boxes, log):
        # TODO(synk): the reference's `empty_frame` try/except path (matcher returns
        #             nothing) is not modelled; a valid matching is assumed.
        pred_logits = outputs['pred_logits']                  # [bs, T, Q, C]
        bs, T, Q, C = pred_logits.shape
        N = bs * T
        fp, tsl = self._tslice(targets)
        bidx, sidx = self._get_src_permutation_idx(indices)

        tn = _choose_tn(N, Q, C)
        n_pad = -(-N // tn) * tn

        # ---- host-side int scatters (small, mirrors the torch reference) ----
        target_classes_b = np.full((n_pad, Q), 3, np.int32)   # 3 == padded-row sentinel
        target_classes_b[:N] = 2
        target_classes = np.full((n_pad, Q), self.num_classes, np.int32)
        weights = np.zeros((n_pad, Q), np.float32)
        weights[:N] = 1.0

        labels_np = np.concatenate([np.asarray(t['labels']) for t in targets], axis=0)
        if labels_np.ndim == 1:
            labels_np = labels_np[None]
        tco = labels_np[:, tsl].T.reshape(-1)
        tco = tco[tco != self.num_classes].astype(np.int32)
        target_classes_b[:N][tsl][bidx, sidx] = 1             # writes through the views
        target_classes[:N][tsl][bidx, sidx] = tco
        weights[bidx, sidx] = self.weight                     # no front-pad offset (as in reference)

        # ---- device tensors: bf16 streams, lane-dense planes ----
        logits = jnp.reshape(pred_logits, (N, Q, C))
        logits_bf = _pad_axis(logits.astype(jnp.bfloat16), n_pad, axis=0)
        lb_planes = _pad_axis(
            jnp.transpose(jnp.reshape(outputs['pred_logits_b'], (N, Q, 3)), (2, 0, 1)
                          ).astype(jnp.bfloat16), n_pad, axis=1)

        # ---- matched boxes, padded to a fixed multiple of 128 matches ----
        m_pad = 128
        num_valid_boxes = 1.0
        sb_t = jnp.zeros((4, m_pad), jnp.float32)
        tb_t = np.zeros((4, m_pad), np.float32)
        bmask = np.zeros((1, m_pad), np.float32)
        if need_boxes:
            pred_boxes = outputs['pred_boxes']                # [bs, T, Q, 4]
            pb = pred_boxes[:, tsl]
            Tv = pb.shape[1]
            src_boxes = jnp.reshape(pb, (bs * Tv, Q, 4))[jnp.asarray(bidx), jnp.asarray(sidx)]
            M = int(src_boxes.shape[0])

            tb = np.concatenate([np.asarray(t['boxes']) for t in targets], axis=0)
            tb = tb[:, 1:].reshape(bs, -1, T, 4)[:, :, tsl, :]
            tb = np.transpose(tb, (0, 2, 1, 3)).reshape(-1, 4)
            valid = ~np.all(tb[:, 1:] == 0.0, axis=1)         # vectorized valid-box filter
            vboxes = tb[valid].astype(np.float32)
            mv = int(vboxes.shape[0])                         # reference assumes mv == M
            num_valid_boxes = float(mv)

            m_pad = max(128, -(-max(M, mv, 1) // 128) * 128)
            sb_t = jnp.zeros((4, m_pad), jnp.float32).at[:, :M].set(
                jnp.transpose(src_boxes.astype(jnp.float32)))
            tb_t = np.zeros((4, m_pad), np.float32)
            tb_t[:, :mv] = vboxes.T
            bmask = np.zeros((1, m_pad), np.float32)
            bmask[0, :mv] = 1.0

        true_label, false_label = self._smoothing()
        call = _build_fused_call(n_pad, tn, Q, C, m_pad,
                                 float(true_label), float(false_label),
                                 float(self.eos_coef), 0.25)
        out = call(logits_bf, lb_planes,
                   jnp.asarray(target_classes), jnp.asarray(target_classes_b),
                   jnp.asarray(weights), sb_t, jnp.asarray(tb_t), jnp.asarray(bmask))
        psum = jnp.sum(out, axis=0)                           # [128] partial-sum reduce

        losses = {}
        if need_labels:
            losses['loss_ce'] = (psum[0] / Q) / N             # mean over queries, / len(src_logits)
            losses['loss_ce_b'] = psum[1] / psum[2]
            if log:
                matched = logits[jnp.asarray(bidx), jnp.asarray(sidx)]    # (reference: no fp offset)
                pred_cls = jnp.argmax(matched, axis=-1)
                acc = 100.0 * jnp.mean((pred_cls == jnp.asarray(tco)).astype(jnp.float32))
                losses['class_error'] = 100.0 - acc
        if need_boxes:
            losses['loss_bbox'] = psum[3] / num_valid_boxes
            losses['loss_giou'] = psum[4] / num_valid_boxes
        return losses

    # --- public loss methods (API parity) ------------------------------------
    def loss_labels(self, outputs, targets, indices, num_boxes, log=True):
        return self._fused_losses(outputs, targets, indices,
                                  need_labels=True, need_boxes=False, log=log)

    def loss_boxes(self, outputs, targets, indices, num_boxes):
        return self._fused_losses(outputs, targets, indices,
                                  need_labels=False, need_boxes=True, log=False)

    def loss_cardinality(self, outputs, targets, indices, num_boxes):
        # logging-only; not reachable via get_loss in the reference either
        pred_logits = outputs['pred_logits']
        bs, T, Q, C = pred_logits.shape
        x = jnp.transpose(pred_logits, (0, 2, 1, 3)).reshape(bs * Q, T, C).astype(jnp.bfloat16)
        card_pred = _build_cardinality_call(bs * Q, T, C)(x).reshape(bs, Q)
        tgt_lengths = jnp.asarray([len(np.asarray(v['labels'])) for v in targets], jnp.float32)
        card_err = jnp.mean(jnp.abs(card_pred - tgt_lengths))   # F.l1_loss broadcast
        return {'cardinality_error': card_err}

    # TODO(synk): loss_masks (bilinear interpolate + nested-tensor padding) not implemented.

    def get_loss(self, loss, outputs, targets, indices, num_boxes, **kwargs):
        loss_map = {'labels': self.loss_labels, 'boxes': self.loss_boxes}
        assert loss in loss_map, f'do you really want to compute {loss} loss?'
        return loss_map[loss](outputs, targets, indices, num_boxes, **kwargs)

    def forward(self, outputs, targets):
        outputs_without_aux = {k: v for k, v in outputs.items() if k != 'aux_outputs'}
        indices = self.matcher(outputs_without_aux, targets)
        _ = float(sum(len(np.asarray(t['labels'])) for t in targets))   # num_boxes (unused, parity)
        need_labels = 'labels' in self.losses
        need_boxes = 'boxes' in self.losses
        losses = {}
        if need_labels or need_boxes:
            losses.update(self._fused_losses(outputs_without_aux, targets, indices,
                                             need_labels=need_labels, need_boxes=need_boxes,
                                             log=True))
        if 'aux_outputs' in outputs:
            for i, aux in enumerate(outputs['aux_outputs']):
                aux_indices = self.matcher(aux, targets)
                if need_labels or need_boxes:
                    l_dict = self._fused_losses(aux, targets, aux_indices,
                                                need_labels=need_labels, need_boxes=need_boxes,
                                                log=False)
                    losses.update({k + f'_{i}': v for k, v in l_dict.items()})
        return losses


def simple_identity_matcher(outputs, targets):
    """Deterministic stand-in for the Hungarian matcher: per valid frame, query a <-> actor a."""
    fp = int(targets[0]['front_pad'])
    ep = int(targets[0]['end_pad'])
    T = outputs['pred_logits'].shape[1]
    T_valid = T - fp - ep
    A = np.asarray(targets[0]['labels']).shape[0]
    return [(np.arange(A, dtype=np.int64), np.arange(A, dtype=np.int64)) for _ in range(T_valid)]


# ----------------------------------------------------------------------------- #
if __name__ == "__main__":
    key = jax.random.PRNGKey(0)
    bs, T, Q, C, A = 1, 8, 8, 24, 2       # batch, frames, queries, num_classes, actors
    fp, ep = 1, 1                         # front / end temporal padding

    k1, k2, k3, k4, k5 = jax.random.split(key, 5)
    pred_logits = jax.random.normal(k1, (bs, T, Q, C), jnp.float32)
    pred_logits_b = jax.random.normal(k2, (bs, T, Q, 3), jnp.float32)
    pred_boxes = jax.random.uniform(k3, (bs, T, Q, 4), jnp.float32, 0.2, 0.6)

    labels = jax.random.randint(k4, (A, T), 0, C).astype(jnp.int32)
    box_coords = jax.random.uniform(k5, (A * T, 4), jnp.float32, 0.2, 0.6)
    boxes = jnp.concatenate([jnp.zeros((A * T, 1), jnp.float32), box_coords], axis=1)

    outputs = {'pred_logits': pred_logits, 'pred_logits_b': pred_logits_b,
               'pred_boxes': pred_boxes}
    targets = [{'labels': labels, 'boxes': boxes, 'front_pad': fp, 'end_pad': ep}]

    criterion = SetCriterionUCFPallas(
        weight=5.0, num_classes=C, num_queries=Q, matcher=simple_identity_matcher,
        weight_dict={'loss_ce': 1.0, 'loss_ce_b': 1.0, 'loss_bbox': 5.0, 'loss_giou': 2.0},
        eos_coef=0.1, losses=['labels', 'boxes'], label_smoothing_alpha=0.1)

    losses = criterion.forward(outputs, targets)

    # exercise the (logging-only) cardinality kernel as well
    indices = simple_identity_matcher(outputs, targets)
    losses.update(criterion.loss_cardinality(outputs, targets, indices, num_boxes=None))

    losses = {k: jnp.asarray(v) for k, v in losses.items()}
    jax.tree_util.tree_map(jax.block_until_ready, losses)
    print("KERNEL_OK")
</pallas_src>

<mosaic_0001>
module attributes {stable_mosaic.version = 11 : i64} {
  func.func @_fused_kernel(%arg0: i32, %arg1: memref<16x8x24xbf16, #tpu.memory_space<vmem>>, %arg2: memref<3x16x8xbf16, #tpu.memory_space<vmem>>, %arg3: memref<16x8xi32, #tpu.memory_space<vmem>>, %arg4: memref<16x8xi32, #tpu.memory_space<vmem>>, %arg5: memref<16x8xf32, #tpu.memory_space<vmem>>, %arg6: memref<4x128xf32, #tpu.memory_space<vmem>>, %arg7: memref<4x128xf32, #tpu.memory_space<vmem>>, %arg8: memref<1x128xf32, #tpu.memory_space<vmem>>, %arg9: memref<8x128xf32, #tpu.memory_space<vmem>>) attributes {dimension_semantics = [#tpu.dimension_semantics<parallel>], iteration_bounds = array<i64: 1>, scalar_prefetch = 0 : i64, scratch_operands = 0 : i64, tpu.core_type = #tpu.core_type<tc>, window_params = [{transform_indices = @transform_0, window_bounds = array<i64: 16, 8, 24>}, {transform_indices = @transform_1, window_bounds = array<i64: 3, 16, 8>}, {transform_indices = @transform_2, window_bounds = array<i64: 16, 8>}, {transform_indices = @transform_3, window_bounds = array<i64: 16, 8>}, {transform_indices = @transform_4, window_bounds = array<i64: 16, 8>}, {pipeline_mode = #tpu.pipeline_mode<synchronous>, transform_indices = @transform_5, window_bounds = array<i64: 4, 128>}, {pipeline_mode = #tpu.pipeline_mode<synchronous>, transform_indices = @transform_6, window_bounds = array<i64: 4, 128>}, {pipeline_mode = #tpu.pipeline_mode<synchronous>, transform_indices = @transform_7, window_bounds = array<i64: 1, 128>}, {transform_indices = @transform_8, window_bounds = array<i64: 8, 128>}]} {
    %c0 = arith.constant 0 : index
    %c0_0 = arith.constant 0 : index
    %c0_1 = arith.constant 0 : index
    %0 = vector.load %arg1[%c0, %c0_0, %c0_1] : memref<16x8x24xbf16, #tpu.memory_space<vmem>>, vector<16x8x24xbf16>
    %1 = arith.extf %0 : vector<16x8x24xbf16> to vector<16x8x24xf32>
    %c0_2 = arith.constant 0 : index
    %c0_3 = arith.constant 0 : index
    %c0_4 = arith.constant 0 : index
    %2 = vector.load %arg2[%c0_2, %c0_3, %c0_4] : memref<3x16x8xbf16, #tpu.memory_space<vmem>>, vector<1x16x8xbf16>
    %3 = vector.shape_cast %2 : vector<1x16x8xbf16> to vector<16x8xbf16>
    %4 = arith.extf %3 : vector<16x8xbf16> to vector<16x8xf32>
    %c1 = arith.constant 1 : index
    %c0_5 = arith.constant 0 : index
    %c0_6 = arith.constant 0 : index
    %5 = vector.load %arg2[%c1, %c0_5, %c0_6] : memref<3x16x8xbf16, #tpu.memory_space<vmem>>, vector<1x16x8xbf16>
    %6 = vector.shape_cast %5 : vector<1x16x8xbf16> to vector<16x8xbf16>
    %7 = arith.extf %6 : vector<16x8xbf16> to vector<16x8xf32>
    %c2 = arith.constant 2 : index
    %c0_7 = arith.constant 0 : index
    %c0_8 = arith.constant 0 : index
    %8 = vector.load %arg2[%c2, %c0_7, %c0_8] : memref<3x16x8xbf16, #tpu.memory_space<vmem>>, vector<1x16x8xbf16>
    %9 = vector.shape_cast %8 : vector<1x16x8xbf16> to vector<16x8xbf16>
    %10 = arith.extf %9 : vector<16x8xbf16> to vector<16x8xf32>
    %c0_9 = arith.constant 0 : index
    %c0_10 = arith.constant 0 : index
    %11 = vector.load %arg3[%c0_9, %c0_10] : memref<16x8xi32, #tpu.memory_space<vmem>>, vector<16x8xi32>
    %c0_11 = arith.constant 0 : index
    %c0_12 = arith.constant 0 : index
    %12 = vector.load %arg4[%c0_11, %c0_12] : memref<16x8xi32, #tpu.memory_space<vmem>>, vector<16x8xi32>
    %c0_13 = arith.constant 0 : index
    %c0_14 = arith.constant 0 : index
    %13 = vector.load %arg5[%c0_13, %c0_14] : memref<16x8xf32, #tpu.memory_space<vmem>>, vector<16x8xf32>
    %14 = arith.maximumf %4, %7 : vector<16x8xf32>
    %15 = arith.maximumf %14, %10 : vector<16x8xf32>
    %16 = arith.subf %4, %15 : vector<16x8xf32>
    %17 = math.exp %16 : vector<16x8xf32>
    %18 = arith.subf %7, %15 : vector<16x8xf32>
    %19 = math.exp %18 : vector<16x8xf32>
    %20 = arith.subf %10, %15 : vector<16x8xf32>
    %21 = math.exp %20 : vector<16x8xf32>
    %22 = arith.addf %17, %19 : vector<16x8xf32>
    %23 = arith.addf %22, %21 : vector<16x8xf32>
    %24 = tpu.reciprocal %23 {approx = true} : vector<16x8xf32> -> vector<16x8xf32>
    %25 = arith.mulf %19, %24 : vector<16x8xf32>
    %26 = math.log %23 : vector<16x8xf32>
    %c0_i32 = arith.constant 0 : i32
    %27 = vector.broadcast %c0_i32 : i32 to vector<16x8xi32>
    %28 = arith.cmpi eq, %12, %27 : vector<16x8xi32>
    %c1_i32 = arith.constant 1 : i32
    %29 = vector.broadcast %c1_i32 : i32 to vector<16x8xi32>
    %30 = arith.cmpi eq, %12, %29 : vector<16x8xi32>
    %31 = arith.select %30, %7, %10 : vector<16x8xi1>, vector<16x8xf32>
    %32 = arith.select %28, %4, %31 : vector<16x8xi1>, vector<16x8xf32>
    %33 = arith.subf %32, %15 : vector<16x8xf32>
    %34 = arith.subf %33, %26 : vector<16x8xf32>
    %c2_i32 = arith.constant 2 : i32
    %35 = vector.broadcast %c2_i32 : i32 to vector<16x8xi32>
    %36 = arith.cmpi sle, %12, %35 : vector<16x8xi32>
    %37 = arith.extui %36 : vector<16x8xi1> to vector<16x8xi32>
    %38 = arith.sitofp %37 : vector<16x8xi32> to vector<16x8xf32>
    %c2_i32_15 = arith.constant 2 : i32
    %39 = vector.broadcast %c2_i32_15 : i32 to vector<16x8xi32>
    %40 = arith.cmpi eq, %12, %39 : vector<16x8xi32>
    %cst = arith.constant 1.000000e-01 : f32
    %cst_16 = arith.constant 1.000000e+00 : f32
    %41 = vector.broadcast %cst : f32 to vector<16x8xf32>
    %42 = vector.broadcast %cst_16 : f32 to vector<16x8xf32>
    %43 = arith.select %40, %41, %42 : vector<16x8xi1>, vector<16x8xf32>
    %44 = arith.mulf %43, %38 : vector<16x8xf32>
    %cst_17 = arith.constant 0.000000e+00 : f32
    %45 = vector.broadcast %cst_17 : f32 to vector<16x8xf32>
    %46 = arith.subf %45, %44 : vector<16x8xf32>
    %47 = arith.mulf %46, %34 : vector<16x8xf32>
    %48 = vector.shape_cast %47 : vector<16x8xf32> to vector<1x16x8xf32>
    %cst_18 = arith.constant dense<0.000000e+00> : vector<1xf32>
    %49 = vector.multi_reduction <add>, %48, %cst_18 [1, 2] : vector<1x16x8xf32> to vector<1xf32>
    %50 = vector.shape_cast %49 : vector<1xf32> to vector<1x1x1xf32>
    %51 = vector.extract %50[0, 0, 0] : f32 from vector<1x1x1xf32>
    %52 = vector.shape_cast %44 : vector<16x8xf32> to vector<1x16x8xf32>
    %cst_19 = arith.constant dense<0.000000e+00> : vector<1xf32>
    %53 = vector.multi_reduction <add>, %52, %cst_19 [1, 2] : vector<1x16x8xf32> to vector<1xf32>
    %54 = vector.shape_cast %53 : vector<1xf32> to vector<1x1x1xf32>
    %55 = vector.extract %54[0, 0, 0] : f32 from vector<1x1x1xf32>
    %56 = vector.shape_cast %25 : vector<16x8xf32> to vector<16x8x1xf32>
    %57 = arith.negf %1 : vector<16x8x24xf32>
    %58 = math.exp %57 : vector<16x8x24xf32>
    %cst_20 = arith.constant 1.000000e+00 : f32
    %59 = vector.broadcast %cst_20 : f32 to vector<16x8x24xf32>
    %60 = arith.addf %59, %58 : vector<16x8x24xf32>
    %61 = arith.divf %59, %60 : vector<16x8x24xf32>
    %62 = vector.broadcast %56 : vector<16x8x1xf32> to vector<16x8x24xf32>
    %63 = arith.mulf %62, %61 : vector<16x8x24xf32>
    %cst_21 = arith.constant 9.99999974E-6 : f32
    %cst_22 = arith.constant 0.999989986 : f32
    %64 = vector.broadcast %cst_21 : f32 to vector<16x8x24xf32>
    %65 = arith.maximumf %64, %63 : vector<16x8x24xf32>
    %66 = vector.broadcast %cst_22 : f32 to vector<16x8x24xf32>
    %67 = arith.minimumf %66, %65 : vector<16x8x24xf32>
    %68 = math.log %67 : vector<16x8x24xf32>
    %cst_23 = arith.constant 1.000000e+00 : f32
    %69 = vector.broadcast %cst_23 : f32 to vector<16x8x24xf32>
    %70 = arith.subf %69, %67 : vector<16x8x24xf32>
    %71 = math.log %70 : vector<16x8x24xf32>
    %72 = tpu.iota {dimensions = array<i32: 2>} : vector<16x8x24xi32>
    %73 = vector.shape_cast %11 : vector<16x8xi32> to vector<16x8x1xi32>
    %74 = vector.broadcast %73 : vector<16x8x1xi32> to vector<16x8x24xi32>
    %75 = arith.cmpi eq, %74, %72 : vector<16x8x24xi32>
    %cst_24 = arith.constant 0.904166638 : f32
    %cst_25 = arith.constant 0.00416666688 : f32
    %76 = vector.broadcast %cst_24 : f32 to vector<16x8x24xf32>
    %77 = vector.broadcast %cst_25 : f32 to vector<16x8x24xf32>
    %78 = arith.select %75, %76, %77 : vector<16x8x24xi1>, vector<16x8x24xf32>
    %79 = arith.mulf %78, %68 : vector<16x8x24xf32>
    %cst_26 = arith.constant 1.000000e+00 : f32
    %80 = vector.broadcast %cst_26 : f32 to vector<16x8x24xf32>
    %81 = arith.subf %80, %78 : vector<16x8x24xf32>
    %82 = arith.mulf %81, %71 : vector<16x8x24xf32>
    %83 = arith.addf %79, %82 : vector<16x8x24xf32>
    %cst_27 = arith.constant 0.000000e+00 : f32
    %84 = vector.broadcast %cst_27 : f32 to vector<16x8x24xf32>
    %85 = arith.subf %84, %83 : vector<16x8x24xf32>
    %86 = arith.mulf %67, %78 : vector<16x8x24xf32>
    %cst_28 = arith.constant 1.000000e+00 : f32
    %87 = vector.broadcast %cst_28 : f32 to vector<16x8x24xf32>
    %88 = arith.subf %87, %67 : vector<16x8x24xf32>
    %cst_29 = arith.constant 1.000000e+00 : f32
    %89 = vector.broadcast %cst_29 : f32 to vector<16x8x24xf32>
    %90 = arith.subf %89, %78 : vector<16x8x24xf32>
    %91 = arith.mulf %88, %90 : vector<16x8x24xf32>
    %92 = arith.addf %86, %91 : vector<16x8x24xf32>
    %cst_30 = arith.constant 1.000000e+00 : f32
    %93 = vector.broadcast %cst_30 : f32 to vector<16x8x24xf32>
    %94 = arith.subf %93, %92 : vector<16x8x24xf32>
    %cst_31 = arith.constant 2.500000e-01 : f32
    %95 = vector.broadcast %cst_31 : f32 to vector<16x8x24xf32>
    %96 = arith.mulf %95, %78 : vector<16x8x24xf32>
    %cst_32 = arith.constant 1.000000e+00 : f32
    %97 = vector.broadcast %cst_32 : f32 to vector<16x8x24xf32>
    %98 = arith.subf %97, %78 : vector<16x8x24xf32>
    %cst_33 = arith.constant 7.500000e-01 : f32
    %99 = vector.broadcast %cst_33 : f32 to vector<16x8x24xf32>
    %100 = arith.mulf %99, %98 : vector<16x8x24xf32>
    %101 = arith.addf %96, %100 : vector<16x8x24xf32>
    %102 = arith.mulf %101, %85 : vector<16x8x24xf32>
    %103 = arith.mulf %102, %94 : vector<16x8x24xf32>
    %104 = arith.mulf %103, %94 : vector<16x8x24xf32>
    %105 = vector.shape_cast %13 : vector<16x8xf32> to vector<16x8x1xf32>
    %106 = vector.broadcast %105 : vector<16x8x1xf32> to vector<16x8x24xf32>
    %107 = arith.mulf %104, %106 : vector<16x8x24xf32>
    %108 = vector.shape_cast %107 : vector<16x8x24xf32> to vector<1x16x8x24xf32>
    %cst_34 = arith.constant dense<0.000000e+00> : vector<1xf32>
    %109 = vector.multi_reduction <add>, %108, %cst_34 [1, 2, 3] : vector<1x16x8x24xf32> to vector<1xf32>
    %110 = vector.shape_cast %109 : vector<1xf32> to vector<1x1x1x1xf32>
    %111 = vector.extract %110[0, 0, 0, 0] : f32 from vector<1x1x1x1xf32>
    %c0_35 = arith.constant 0 : index
    %c0_36 = arith.constant 0 : index
    %112 = vector.load %arg6[%c0_35, %c0_36] : memref<4x128xf32, #tpu.memory_space<vmem>>, vector<4x128xf32>
    %c0_37 = arith.constant 0 : index
    %c0_38 = arith.constant 0 : index
    %113 = vector.load %arg7[%c0_37, %c0_38] : memref<4x128xf32, #tpu.memory_space<vmem>>, vector<4x128xf32>
    %c0_39 = arith.constant 0 : index
    %c0_40 = arith.constant 0 : index
    %114 = vector.load %arg8[%c0_39, %c0_40] : memref<1x128xf32, #tpu.memory_space<vmem>>, vector<1x128xf32>
    %115 = arith.subf %112, %113 : vector<4x128xf32>
    %116 = math.absf %115 : vector<4x128xf32>
    %117 = vector.broadcast %114 : vector<1x128xf32> to vector<4x128xf32>
    %118 = arith.mulf %116, %117 : vector<4x128xf32>
    %119 = vector.shape_cast %118 : vector<4x128xf32> to vector<1x4x128xf32>
    %cst_41 = arith.constant dense<0.000000e+00> : vector<1xf32>
    %120 = vector.multi_reduction <add>, %119, %cst_41 [1, 2] : vector<1x4x128xf32> to vector<1xf32>
    %121 = vector.shape_cast %120 : vector<1xf32> to vector<1x1x1xf32>
    %122 = vector.extract %121[0, 0, 0] : f32 from vector<1x1x1xf32>
    %123 = vector.extract_strided_slice %112 {offsets = [0, 0], sizes = [1, 128], strides = [1, 1]} : vector<4x128xf32> to vector<1x128xf32>
    %124 = vector.extract_strided_slice %112 {offsets = [1, 0], sizes = [1, 128], strides = [1, 1]} : vector<4x128xf32> to vector<1x128xf32>
    %125 = vector.extract_strided_slice %112 {offsets = [2, 0], sizes = [1, 128], strides = [1, 1]} : vector<4x128xf32> to vector<1x128xf32>
    %126 = vector.extract_strided_slice %112 {offsets = [3, 0], sizes = [1, 128], strides = [1, 1]} : vector<4x128xf32> to vector<1x128xf32>
    %cst_42 = arith.constant 5.000000e-01 : f32
    %127 = vector.broadcast %cst_42 : f32 to vector<1x128xf32>
    %128 = arith.mulf %127, %125 : vector<1x128xf32>
    %129 = arith.subf %123, %128 : vector<1x128xf32>
    %cst_43 = arith.constant 5.000000e-01 : f32
    %130 = vector.broadcast %cst_43 : f32 to vector<1x128xf32>
    %131 = arith.mulf %130, %126 : vector<1x128xf32>
    %132 = arith.subf %124, %131 : vector<1x128xf32>
    %cst_44 = arith.constant 5.000000e-01 : f32
    %133 = vector.broadcast %cst_44 : f32 to vector<1x128xf32>
    %134 = arith.mulf %133, %125 : vector<1x128xf32>
    %135 = arith.addf %123, %134 : vector<1x128xf32>
    %cst_45 = arith.constant 5.000000e-01 : f32
    %136 = vector.broadcast %cst_45 : f32 to vector<1x128xf32>
    %137 = arith.mulf %136, %126 : vector<1x128xf32>
    %138 = arith.addf %124, %137 : vector<1x128xf32>
    %139 = vector.extract_strided_slice %113 {offsets = [0, 0], sizes = [1, 128], strides = [1, 1]} : vector<4x128xf32> to vector<1x128xf32>
    %140 = vector.extract_strided_slice %113 {offsets = [1, 0], sizes = [1, 128], strides = [1, 1]} : vector<4x128xf32> to vector<1x128xf32>
    %141 = vector.extract_strided_slice %113 {offsets = [2, 0], sizes = [1, 128], strides = [1, 1]} : vector<4x128xf32> to vector<1x128xf32>
    %142 = vector.extract_strided_slice %113 {offsets = [3, 0], sizes = [1, 128], strides = [1, 1]} : vector<4x128xf32> to vector<1x128xf32>
    %cst_46 = arith.constant 5.000000e-01 : f32
    %143 = vector.broadcast %cst_46 : f32 to vector<1x128xf32>
    %144 = arith.mulf %143, %141 : vector<1x128xf32>
    %145 = arith.subf %139, %144 : vector<1x128xf32>
    %cst_47 = arith.constant 5.000000e-01 : f32
    %146 = vector.broadcast %cst_47 : f32 to vector<1x128xf32>
    %147 = arith.mulf %146, %142 : vector<1x128xf32>
    %148 = arith.subf %140, %147 : vector<1x128xf32>
    %cst_48 = arith.constant 5.000000e-01 : f32
    %149 = vector.broadcast %cst_48 : f32 to vector<1x128xf32>
    %150 = arith.mulf %149, %141 : vector<1x128xf32>
    %151 = arith.addf %139, %150 : vector<1x128xf32>
    %cst_49 = arith.constant 5.000000e-01 : f32
    %152 = vector.broadcast %cst_49 : f32 to vector<1x128xf32>
    %153 = arith.mulf %152, %142 : vector<1x128xf32>
    %154 = arith.addf %140, %153 : vector<1x128xf32>
    %155 = arith.subf %135, %129 : vector<1x128xf32>
    %156 = arith.subf %138, %132 : vector<1x128xf32>
    %157 = arith.mulf %155, %156 : vector<1x128xf32>
    %158 = arith.subf %151, %145 : vector<1x128xf32>
    %159 = arith.subf %154, %148 : vector<1x128xf32>
    %160 = arith.mulf %158, %159 : vector<1x128xf32>
    %161 = arith.minimumf %135, %151 : vector<1x128xf32>
    %162 = arith.maximumf %129, %145 : vector<1x128xf32>
    %163 = arith.subf %161, %162 : vector<1x128xf32>
    %cst_50 = arith.constant 0.000000e+00 : f32
    %164 = vector.broadcast %cst_50 : f32 to vector<1x128xf32>
    %165 = arith.maximumf %163, %164 : vector<1x128xf32>
    %166 = arith.minimumf %138, %154 : vector<1x128xf32>
    %167 = arith.maximumf %132, %148 : vector<1x128xf32>
    %168 = arith.subf %166, %167 : vector<1x128xf32>
    %cst_51 = arith.constant 0.000000e+00 : f32
    %169 = vector.broadcast %cst_51 : f32 to vector<1x128xf32>
    %170 = arith.maximumf %168, %169 : vector<1x128xf32>
    %171 = arith.mulf %165, %170 : vector<1x128xf32>
    %172 = arith.addf %157, %160 : vector<1x128xf32>
    %173 = arith.subf %172, %171 : vector<1x128xf32>
    %cst_52 = arith.constant 1.000000e-07 : f32
    %174 = vector.broadcast %cst_52 : f32 to vector<1x128xf32>
    %175 = arith.maximumf %173, %174 : vector<1x128xf32>
    %176 = tpu.reciprocal %175 {approx = true} : vector<1x128xf32> -> vector<1x128xf32>
    %177 = arith.mulf %171, %176 : vector<1x128xf32>
    %178 = arith.maximumf %135, %151 : vector<1x128xf32>
    %179 = arith.minimumf %129, %145 : vector<1x128xf32>
    %180 = arith.subf %178, %179 : vector<1x128xf32>
    %cst_53 = arith.constant 0.000000e+00 : f32
    %181 = vector.broadcast %cst_53 : f32 to vector<1x128xf32>
    %182 = arith.maximumf %180, %181 : vector<1x128xf32>
    %183 = arith.maximumf %138, %154 : vector<1x128xf32>
    %184 = arith.minimumf %132, %148 : vector<1x128xf32>
    %185 = arith.subf %183, %184 : vector<1x128xf32>
    %cst_54 = arith.constant 0.000000e+00 : f32
    %186 = vector.broadcast %cst_54 : f32 to vector<1x128xf32>
    %187 = arith.maximumf %185, %186 : vector<1x128xf32>
    %188 = arith.mulf %182, %187 : vector<1x128xf32>
    %cst_55 = arith.constant 1.000000e-07 : f32
    %189 = vector.broadcast %cst_55 : f32 to vector<1x128xf32>
    %190 = arith.maximumf %188, %189 : vector<1x128xf32>
    %191 = tpu.reciprocal %190 {approx = true} : vector<1x128xf32> -> vector<1x128xf32>
    %192 = arith.subf %188, %173 : vector<1x128xf32>
    %193 = arith.mulf %192, %191 : vector<1x128xf32>
    %194 = arith.subf %177, %193 : vector<1x128xf32>
    %cst_56 = arith.constant 1.000000e+00 : f32
    %195 = vector.broadcast %cst_56 : f32 to vector<1x128xf32>
    %196 = arith.subf %195, %194 : vector<1x128xf32>
    %197 = arith.mulf %196, %114 : vector<1x128xf32>
    %198 = vector.shape_cast %197 : vector<1x128xf32> to vector<1x1x128xf32>
    %cst_57 = arith.constant dense<0.000000e+00> : vector<1xf32>
    %199 = vector.multi_reduction <add>, %198, %cst_57 [1, 2] : vector<1x1x128xf32> to vector<1xf32>
    %200 = vector.shape_cast %199 : vector<1xf32> to vector<1x1x1xf32>
    %201 = vector.extract %200[0, 0, 0] : f32 from vector<1x1x1xf32>
    %c0_i32_58 = arith.constant 0 : i32
    %202 = arith.cmpi eq, %arg0, %c0_i32_58 : i32
    %cst_59 = arith.constant 1.000000e+00 : f32
    %cst_60 = arith.constant 0.000000e+00 : f32
    %203 = arith.select %202, %cst_59, %cst_60 : f32
    %204 = arith.mulf %122, %203 : f32
    %205 = arith.mulf %201, %203 : f32
    %206 = tpu.iota {dimensions = array<i32: 0>} : vector<8x128xi32>
    %207 = tpu.iota {dimensions = array<i32: 1>} : vector<8x128xi32>
    %c0_i32_61 = arith.constant 0 : i32
    %208 = vector.broadcast %c0_i32_61 : i32 to vector<8x128xi32>
    %209 = arith.cmpi eq, %206, %208 : vector<8x128xi32>
    %210 = arith.extui %209 : vector<8x128xi1> to vector<8x128xi32>
    %211 = arith.sitofp %210 : vector<8x128xi32> to vector<8x128xf32>
    %c0_i32_62 = arith.constant 0 : i32
    %212 = vector.broadcast %c0_i32_62 : i32 to vector<8x128xi32>
    %213 = arith.cmpi eq, %207, %212 : vector<8x128xi32>
    %214 = arith.extui %213 : vector<8x128xi1> to vector<8x128xi32>
    %215 = arith.sitofp %214 : vector<8x128xi32> to vector<8x128xf32>
    %216 = vector.broadcast %111 : f32 to vector<8x128xf32>
    %217 = arith.mulf %216, %215 : vector<8x128xf32>
    %c1_i32_63 = arith.constant 1 : i32
    %218 = vector.broadcast %c1_i32_63 : i32 to vector<8x128xi32>
    %219 = arith.cmpi eq, %207, %218 : vector<8x128xi32>
    %220 = arith.extui %219 : vector<8x128xi1> to vector<8x128xi32>
    %221 = arith.sitofp %220 : vector<8x128xi32> to vector<8x128xf32>
    %222 = vector.broadcast %51 : f32 to vector<8x128xf32>
    %223 = arith.mulf %222, %221 : vector<8x128xf32>
    %224 = arith.addf %217, %223 : vector<8x128xf32>
    %c2_i32_64 = arith.constant 2 : i32
    %225 = vector.broadcast %c2_i32_64 : i32 to vector<8x128xi32>
    %226 = arith.cmpi eq, %207, %225 : vector<8x128xi32>
    %227 = arith.extui %226 : vector<8x128xi1> to vector<8x128xi32>
    %228 = arith.sitofp %227 : vector<8x128xi32> to vector<8x128xf32>
    %229 = vector.broadcast %55 : f32 to vector<8x128xf32>
    %230 = arith.mulf %229, %228 : vector<8x128xf32>
    %231 = arith.addf %224, %230 : vector<8x128xf32>
    %c3_i32 = arith.constant 3 : i32
    %232 = vector.broadcast %c3_i32 : i32 to vector<8x128xi32>
    %233 = arith.cmpi eq, %207, %232 : vector<8x128xi32>
    %234 = arith.extui %233 : vector<8x128xi1> to vector<8x128xi32>
    %235 = arith.sitofp %234 : vector<8x128xi32> to vector<8x128xf32>
    %236 = vector.broadcast %204 : f32 to vector<8x128xf32>
    %237 = arith.mulf %236, %235 : vector<8x128xf32>
    %238 = arith.addf %231, %237 : vector<8x128xf32>
    %c4_i32 = arith.constant 4 : i32
    %239 = vector.broadcast %c4_i32 : i32 to vector<8x128xi32>
    %240 = arith.cmpi eq, %207, %239 : vector<8x128xi32>
    %241 = arith.extui %240 : vector<8x128xi1> to vector<8x128xi32>
    %242 = arith.sitofp %241 : vector<8x128xi32> to vector<8x128xf32>
    %243 = vector.broadcast %205 : f32 to vector<8x128xf32>
    %244 = arith.mulf %243, %242 : vector<8x128xf32>
    %245 = arith.addf %238, %244 : vector<8x128xf32>
    %246 = arith.mulf %211, %245 : vector<8x128xf32>
    %c0_65 = arith.constant 0 : index
    %c0_66 = arith.constant 0 : index
    %247 = vector.load %arg9[%c0_65, %c0_66] : memref<8x128xf32, #tpu.memory_space<vmem>>, vector<8x128xf32>
    tpu.vector_store %arg9[%c0_65, %c0_66], %246 {strides = array<i32>} : memref<8x128xf32, #tpu.memory_space<vmem>>, vector<8x128xf32>,
    return
  }
  func.func @transform_0(%arg0: i32) -> (i32, i32, i32) {
    %c0_i32 = arith.constant 0 : i32
    %c0_i32_0 = arith.constant 0 : i32
    %c0_i32_1 = arith.constant 0 : i32
    return %arg0, %c0_i32, %c0_i32_0 : i32, i32, i32
  }
  func.func @transform_1(%arg0: i32) -> (i32, i32, i32) {
    %c0_i32 = arith.constant 0 : i32
    %c0_i32_0 = arith.constant 0 : i32
    %c0_i32_1 = arith.constant 0 : i32
    return %c0_i32, %arg0, %c0_i32_0 : i32, i32, i32
  }
  func.func @transform_2(%arg0: i32) -> (i32, i32) {
    %c0_i32 = arith.constant 0 : i32
    %c0_i32_0 = arith.constant 0 : i32
    return %arg0, %c0_i32 : i32, i32
  }
  func.func @transform_3(%arg0: i32) -> (i32, i32) {
    %c0_i32 = arith.constant 0 : i32
    %c0_i32_0 = arith.constant 0 : i32
    return %arg0, %c0_i32 : i32, i32
  }
  func.func @transform_4(%arg0: i32) -> (i32, i32) {
    %c0_i32 = arith.constant 0 : i32
    %c0_i32_0 = arith.constant 0 : i32
    return %arg0, %c0_i32 : i32, i32
  }
  func.func @transform_5(%arg0: i32) -> (i32, i32) {
    %c0_i32 = arith.constant 0 : i32
    %c0_i32_0 = arith.constant 0 : i32
    %c0_i32_1 = arith.constant 0 : i32
    return %c0_i32, %c0_i32_0 : i32, i32
  }
  func.func @transform_6(%arg0: i32) -> (i32, i32) {
    %c0_i32 = arith.constant 0 : i32
    %c0_i32_0 = arith.constant 0 : i32
    %c0_i32_1 = arith.constant 0 : i32
    return %c0_i32, %c0_i32_0 : i32, i32
  }
  func.func @transform_7(%arg0: i32) -> (i32, i32) {
    %c0_i32 = arith.constant 0 : i32
    %c0_i32_0 = arith.constant 0 : i32
    %c0_i32_1 = arith.constant 0 : i32
    return %c0_i32, %c0_i32_0 : i32, i32
  }
  func.func @transform_8(%arg0: i32) -> (i32, i32) {
    %c0_i32 = arith.constant 0 : i32
    %c0_i32_0 = arith.constant 0 : i32
    return %arg0, %c0_i32 : i32, i32
  }
}

</mosaic_0001>

<bundles_post_ra>
// kernel: tpu_custom_call.1
= control target key start
LH: loop header
LB: loop body
LE: loop exit
PB: predicated region body
PF: predicated region fallthrough
CT: control target
= control target key end

     0   :  { %v169_v0 = vlaneseq  ;;  %s2333_s0 = inlined_call_operand.vmem [shape: bf16[16,8,24], index: 0, kind: input, shape index: {}]   ;;  %s2334_s1 = inlined_call_operand.vmem [shape: bf16[3,16,8], index: 1, kind: input, shape index: {}]   ;;  %s2335_s2 = inlined_call_operand.vmem [shape: s32[16,8], index: 2, kind: input, shape index: {}]   ;;  %s2336_s3 = inlined_call_operand.vmem [shape: s32[16,8], index: 3, kind: input, shape index: {}]   ;;  %s2337_s4 = inlined_call_operand.vmem [shape: f32[16,8], index: 4, kind: input, shape index: {}]   ;;  %s2338_s5 = inlined_call_operand.vmem [shape: f32[4,128], index: 5, kind: input, shape index: {}]   ;;  %s2339_s6 = inlined_call_operand.vmem [shape: f32[4,128], index: 6, kind: input, shape index: {}]   ;;  %s2340_s7 = inlined_call_operand.vmem [shape: f32[1,128], index: 7, kind: input, shape index: {}]   ;;  %s2341_s8 = inlined_call_operand.hbm [shape: f32[8,128], index: 8, kind: output, shape index: {}]  }
   0x1   :  { %v1259_v1 = vld [vmem:[%s2334_s1] sm:$0xff]   ;;  %v1277_v2 = vld [vmem:[%s2334_s1 + $0x8] sm:$0xff]   ;;  %v1278_v5 = vld [vmem:[%s2334_s1 + $0x10] sm:$0xff]  }
   0x2   :  { %v1526_v3 = vunpack.c.l.bf16 %v1259_v1  ;;  %v1528_v4 = vunpack.c.l.bf16 %v1277_v2  ;;  %v1533_v6 = vunpack.c.h.bf16 %v1259_v1  ;;  %v1535_v7 = vunpack.c.h.bf16 %v1277_v2  ;;  %v1545_v10 = vld [vmem:[%s2335_s2] sm:$0xff] }
   0x3   :  { %v1538_v8 = vshrl.u32 %v169_v0, 7  ;;  %v1540_v9 = vunpack.c.l.bf16 %v1278_v5 }
   0x4   :  { %v82_v11 = vmax.f32 %v1526_v3, %v1528_v4 }
   0x5   :  { %2366 = vst [vmem:[#allocation5_spill] sm:$0xff] %v1538_v8 }
   0x6   :  { %13 = vsyncpa [#allocation3], 0  ;;  %v1550_v12 = vsub.s32 1, %v1538_v8  ;;  %v1553_v13 = vsub.s32 2, %v1538_v8  ;;  %v1555_v14 = vunpack.c.h.bf16 %v1278_v5  ;;  %v83_v15 = vmax.f32 %v1533_v6, %v1535_v7  ;;  %s1474_s21 = smov [#allocation2]  }
   0x7   :  { %v1560_v16 = vsub.s32 0, %v1538_v8  ;;  %v1563_v17 = vmax.f32 %v82_v11, %v1540_v9  ;;  %v1568_v19 = vsub.s32 3, %v1538_v8  ;;  %v1590_v32 = vsub.s32 4, %v1538_v8  ;;  %s1190_s22 = sshll.u32 %s1474_s21, 4  ;;  %s1191_s22 = int_to_ptr.vmem [resolvable:$true] %s1190_s22 }
   0x8   :  { %v517_v18 = vrot.slane %v1545_v10, %v1550_v12  ;;  %v524_v22 = vrot.slane %v1545_v10, %v1553_v13  ;;  %v1581_v25 = vmax.f32 %v83_v15, %v1555_v14  ;;  %v1597_v37 = vsub.s32 5, %v1538_v8  ;;  %s1447_s23 = scalar_lea.vmem %s1191_s22, 128  ;;  %p1452_p1 = scmp.lt.s32.totalorder %s1191_s22, %s1191_s22 }
   0x9   :  { %2367 = vst [vmem:[#allocation6_spill] sm:$0xff] %v1560_v16  ;;  %v510_v20 = vrot.slane %v1545_v10, %v1560_v16  ;;  %v86_v21 = vsub.f32 %v1526_v3, %v1563_v17  ;;  %v92_v23 = vsub.f32 %v1528_v4, %v1563_v17  ;;  %v98_v24 = vsub.f32 %v1540_v9, %v1563_v17  ;;  %p1448_p0 = scmp.ne.s32.totalorder %s1191_s22, %s1447_s23  ;;  %p1453_p2 = scmp.lt.s32.totalorder %s1447_s23, %s1447_s23 }
   0xa   :  { %519 = vbcast.lane.b32.xlu1 %v517_v18, 256  ;;  %v87_v29 = vsub.f32 %v1533_v6, %v1581_v25  ;;  %v93_v30 = vsub.f32 %v1535_v7, %v1581_v25  ;;  %v531_v31 = vrot.slane %v1545_v10, %v1568_v19  ;;  %v99_v35 = vsub.f32 %v1555_v14, %v1581_v25  ;;  %v1631_v18 = vld [vmem:[%s2335_s2 + $0x8] sm:$0xff] }
   0xb   :  { %512 = vbcast.lane.b32.xlu0 %v510_v20, 256  ;;  %v88_v26 = vmul.f32 1.442695, %v86_v21  ;;  %v94_v27 = vmul.f32 1.442695, %v92_v23  ;;  %v538_v36 = vrot.slane %v1545_v10, %v1590_v32  ;;  %v545_v39 = vrot.slane %v1545_v10, %v1597_v37  ;;  %p1454_p3 = por %p1453_p2, %p1452_p1 }
   0xc   :  { %v100_v28 = vmul.f32 1.442695, %v98_v24  ;;  %v90_v33 = vmul.f32 1.442695, %v87_v29  ;;  %v96_v34 = vmul.f32 1.442695, %v93_v30  ;;  %v573_v20 = vrot.slane %v1631_v18, %v1550_v12 }
   0xd   :  { %1293 = vpow2.f32 %v88_v26  ;;  %v102_v38 = vmul.f32 1.442695, %v99_v35  ;;  %v1602_v40 = vsub.s32 6, %v1538_v8  ;;  %v1619_v60 = vsub.s32 7, %v1538_v8  ;;  %p1455_p4 = pnand %p1454_p3, %p1448_p0 }
   0xe   :  { %526 = vbcast.lane.b32.xlu1 %v524_v22, 256  ;;  %1295 = vpow2.f32 %v94_v27  ;;  %v80_v22 = vld [vmem:[%s2337_s4] sm:$0xff]  ;;  %vm144_vm15 = vcmask 64512  }
   0xf   :  { %1297 = vpow2.f32 %v100_v28  ;;  %v552_v45 = vrot.slane %v1545_v10, %v1602_v40  ;;  %v559_v11 = vrot.slane %v1545_v10, %v1619_v60  ;;  %v901_v10 = vrot.slane %v80_v22, %v1550_v12 }
  0x10   :  { %1299 = vpow2.f32 %v90_v33  ;;  %v908_v24 = vrot.slane %v80_v22, %v1553_v13  ;;  %v915_v27 = vrot.slane %v80_v22, %v1568_v19  ;;  %v922_v29 = vrot.slane %v80_v22, %v1590_v32 }
  0x11   :  { %1301 = vpow2.f32 %v96_v34  ;;  %v566_v33 = vrot.slane %v1631_v18, %v1560_v16  ;;  %v936_v34 = vrot.slane %v80_v22, %v1602_v40  ;;  %v894_v35 = vrot.slane %v80_v22, %v1560_v16 }
  0x12   :  { %533 = vbcast.lane.b32.xlu1 %v531_v31, 256  ;;  %1303 = vpow2.f32 %v102_v38  ;;  %v929_v31 = vrot.slane %v80_v22, %v1597_v37  ;;  %v580_v38 = vrot.slane %v1631_v18, %v1553_v13 }
  0x16   :  { %540 = vbcast.lane.b32.xlu1 %v538_v36, 256  ;;  %v943_v36 = vrot.slane %v80_v22, %v1619_v60 }
  0x17   :  { %v1294_v41 = vpop.eup %1293 }
  0x18   :  { %v1296_v42 = vpop.eup %1295 }
  0x19   :  { %v1298_v43 = vpop.eup %1297  ;;  %v104_v44 = vadd.f32 %v1296_v42, %v1294_v41  ;;  %v1270_v41 = vld [vmem:[%s2333_s0 + $0x8] sm:$0xff]  }
  0x1a   :  { %547 = vbcast.lane.b32.xlu1 %v545_v39, 256  ;;  %v1300_v46 = vpop.eup %1299  ;;  %v1658_v39 = vld [vmem:[%s2337_s4 + $0x8] sm:$0xff] }
  0x1b   :  { %v1606_v47 = vadd.f32 %v1298_v43, %v104_v44  ;;  %v1302_v48 = vpop.eup %1301  ;;  %v587_v43 = vrot.slane %v1631_v18, %v1568_v19  ;;  %v1227_v44 = vld [vmem:[%s2333_s0] sm:$0xff]   ;;  %v999_v22 = vrot.slane %v1658_v39, %v1619_v60 }
  0x1c   :  { %v105_v49 = vadd.f32 %v1302_v48, %v1300_v46  ;;  %v1304_v50 = vpop.eup %1303  ;;  %v1228_v46 = vunpack.c.l.bf16 %v1227_v44 }
  0x1d   :  { %1305 = vrcp.f32 %v1606_v47 }
  0x1e   :  { %554 = vbcast.lane.b32.xlu1 %v552_v45, 256  ;;  %v1609_v51 = vadd.f32 %v1304_v50, %v105_v49  ;;  %v1232_v45 = vunpack.c.l.bf16 %v1270_v41  ;;  %v594_v49 = vrot.slane %v1631_v18, %v1590_v32  ;;  %v1233_v50 = vunpack.c.h.bf16 %v1270_v41 }
  0x20   :  { %1307 = vrcp.f32 %v1609_v51 }
  0x27   :  { %v1306_v52 = vpop.eup %1305 }
  0x28   :  { %v110_v53 = vmul.f32 %v1306_v52, %v1296_v42  ;;  %v957_v42 = vrot.slane %v1658_v39, %v1550_v12  ;;  %v1229_v52 = vunpack.c.h.bf16 %v1227_v44  ;;  %v950_v44 = vrot.slane %v1658_v39, %v1560_v16 }
  0x2a   :  { %v186_v54 = vrot.slane %v110_v53, %v1553_v13  ;;  %v172_v55 = vrot.slane %v110_v53, %v1560_v16  ;;  %v193_v56 = vrot.slane %v110_v53, %v1568_v19  ;;  %v179_v57 = vrot.slane %v110_v53, %v1550_v12  ;;  %v1308_v61 = vpop.eup %1307 }
  0x2b   :  { %v207_v58 = vrot.slane %v110_v53, %v1597_v37  ;;  %v200_v59 = vrot.slane %v110_v53, %v1590_v32  ;;  %v221_v62 = vrot.slane %v110_v53, %v1619_v60  ;;  %v214_v63 = vrot.slane %v110_v53, %v1602_v40 }
  0x2c   :  { %188 = vbcast.lane.b32.xlu1 %v186_v54, 256  ;;  %174 = vbcast.lane.b32.xlu0 %v172_v55, 256  ;;  %v111_v1 = vmul.f32 %v1308_v61, %v1302_v48  ;;  %v1271_v48 = vld [vmem:[%s2333_s0 + $0x10] sm:$0xff]   ;;  %v1206_v53 = vmul.f32 -1.442695, %v1232_v45  ;;  %v1272_v55 = vld [vmem:[%s2333_s0 + $0x18] sm:$0xff]  }
  0x2d   :  { %v1237_v54 = vunpack.c.h.bf16 %v1271_v48  ;;  %v1207_v61 = vmul.f32 -1.442695, %v1233_v50  ;;  %v964_v50 = vrot.slane %v1658_v39, %v1553_v13 }
  0x2e   :  { %v235_v2 = vrot.slane %v111_v1, %v1550_v12  ;;  %v228_v5 = vrot.slane %v111_v1, %v1560_v16  ;;  %v242_v15 = vrot.slane %v111_v1, %v1553_v13  ;;  %v249_v21 = vrot.slane %v111_v1, %v1568_v19 }
  0x2f   :  { %v256_v23 = vrot.slane %v111_v1, %v1590_v32  ;;  %v263_v26 = vrot.slane %v111_v1, %v1597_v37  ;;  %v270_v28 = vrot.slane %v111_v1, %v1602_v40  ;;  %v277_v30 = vrot.slane %v111_v1, %v1619_v60 }
  0x30   :  { %195 = vbcast.lane.b32.xlu1 %v193_v56, 256  ;;  %181 = vbcast.lane.b32.xlu0 %v179_v57, 256  ;;  %v971_v12 = vrot.slane %v1658_v39, %v1568_v19  ;;  %v1204_v56 = vmul.f32 -1.442695, %v1228_v46  ;;  %v1236_v57 = vunpack.c.l.bf16 %v1271_v48  ;;  %v1241_v19 = vunpack.c.h.bf16 %v1272_v55 }
  0x31   :  { %v1240_v1 = vunpack.c.l.bf16 %v1272_v55  ;;  %1309 = vpow2.f32 %v1206_v53  ;;  %v1709_v13 = vand.u32 127, %v169_v0 }
  0x32   :  { %1311 = vpow2.f32 %v1204_v56 }
  0x33   :  { %1313 = vpow2.f32 %v1207_v61  ;;  %v978_v61 = vrot.slane %v1658_v39, %v1590_v32  ;;  %v992_v32 = vrot.slane %v1658_v39, %v1602_v40 }
  0x34   :  { %209 = vbcast.lane.b32.xlu1 %v207_v58, 256  ;;  %202 = vbcast.lane.b32.xlu0 %v200_v59, 256  ;;  %v601_v58 = vrot.slane %v1631_v18, %v1597_v37  ;;  %v985_v59 = vrot.slane %v1658_v39, %v1597_v37  ;;  %v1208_v37 = vmul.f32 -1.442695, %v1236_v57 }
  0x38   :  { %223 = vbcast.lane.b32.xlu1 %v221_v62, 256  ;;  %216 = vbcast.lane.b32.xlu0 %v214_v63, 256  ;;  %v1273_v62 = vld [vmem:[%s2333_s0 + $0x20] sm:$0xff]   ;;  %v1205_v63 = vmul.f32 -1.442695, %v1229_v52 }
  0x3a   :  { %1315 = vpow2.f32 %v1205_v63 }
  0x3c   :  { %237 = vbcast.lane.b32.xlu1 %v235_v2, 256  ;;  %230 = vbcast.lane.b32.xlu0 %v228_v5, 256  ;;  %v1274_v2 = vld [vmem:[%s2333_s0 + $0x28] sm:$0xff]   ;;  %v1209_v5 = vmul.f32 -1.442695, %v1237_v54 }
  0x3e   :  { %1317 = vpow2.f32 %v1209_v5 }
  0x3f   :  { %1319 = vpow2.f32 %v1208_v37 }
  0x40   :  { %561 = vbcast.lane.b32.xlu1 %v559_v11, 256  ;;  %244 = vbcast.lane.b32.xlu0 %v242_v15, 256  ;;  %v1245_v11 = vunpack.c.h.bf16 %v1273_v62  ;;  %v608_v15 = vrot.slane %v1631_v18, %v1602_v40 }
  0x44   :  { %575 = vbcast.lane.b32.xlu1 %v573_v20, 256  ;;  %251 = vbcast.lane.b32.xlu0 %v249_v21, 256  ;;  %v1244_v20 = vunpack.c.l.bf16 %v1273_v62  ;;  %v1275_v21 = vld [vmem:[%s2333_s0 + $0x30] sm:$0xff]  }
  0x48   :  { %903 = vbcast.lane.b32.xlu1 %v901_v10, 256  ;;  %258 = vbcast.lane.b32.xlu0 %v256_v23, 256  ;;  %v1211_v10 = vmul.f32 -1.442695, %v1241_v19  ;;  %v1248_v23 = vunpack.c.l.bf16 %v1274_v2 }
  0x4a   :  { %1321 = vpow2.f32 %v1211_v10 }
  0x4c   :  { %910 = vbcast.lane.b32.xlu1 %v908_v24, 256  ;;  %265 = vbcast.lane.b32.xlu0 %v263_v26, 256  ;;  %v1210_v24 = vmul.f32 -1.442695, %v1240_v1  ;;  %v1249_v26 = vunpack.c.h.bf16 %v1274_v2 }
  0x4e   :  { %1323 = vpow2.f32 %v1210_v24 }
  0x50   :  { %917 = vbcast.lane.b32.xlu1 %v915_v27, 256  ;;  %272 = vbcast.lane.b32.xlu0 %v270_v28, 256  ;;  %v1276_v27 = vld [vmem:[%s2333_s0 + $0x38] sm:$0xff]   ;;  %v1213_v28 = vmul.f32 -1.442695, %v1245_v11 }
  0x52   :  { %1325 = vpow2.f32 %v1213_v28 }
  0x54   :  { %924 = vbcast.lane.b32.xlu1 %v922_v29, 256  ;;  %279 = vbcast.lane.b32.xlu0 %v277_v30, 256  ;;  %v1252_v29 = vunpack.c.l.bf16 %v1275_v21  ;;  %v1212_v30 = vmul.f32 -1.442695, %v1244_v20 }
  0x56   :  { %v1216_v41 = vmul.f32 -1.442695, %v1252_v29  ;;  %1327 = vpow2.f32 %v1212_v30 }
  0x58   :  { %931 = vbcast.lane.b32.xlu1 %v929_v31, 256  ;;  %568 = vbcast.lane.b32.xlu0 %v566_v33, 256  ;;  %v1253_v31 = vunpack.c.h.bf16 %v1275_v21  ;;  %v615_v33 = vrot.slane %v1631_v18, %v1619_v60 }
  0x5c   :  { %938 = vbcast.lane.b32.xlu1 %v936_v34, 256  ;;  %896 = vbcast.lane.b32.xlu0 %v894_v35, 256  ;;  %v1214_v34 = vmul.f32 -1.442695, %v1248_v23  ;;  %v1256_v35 = vunpack.c.l.bf16 %v1276_v27 }
  0x5e   :  { %1329 = vpow2.f32 %v1214_v34  ;;  %v1218_v45 = vmul.f32 -1.442695, %v1256_v35 }
  0x60   :  { %945 = vbcast.lane.b32.xlu1 %v943_v36, 256  ;;  %582 = vbcast.lane.b32.xlu0 %v580_v38, 256  ;;  %v1215_v36 = vmul.f32 -1.442695, %v1249_v26  ;;  %v1257_v38 = vunpack.c.h.bf16 %v1276_v27  ;;  %v2344_v27 = vmov 0.004166667  }
  0x62   :  { %1331 = vpow2.f32 %v1215_v36  ;;  %v1219_v60 = vmul.f32 -1.442695, %v1257_v38 }
  0x63   :  { %1333 = vpow2.f32 %v1216_v41 }
  0x64   :  { %959 = vbcast.lane.b32.xlu1 %v957_v42, 256  ;;  %589 = vbcast.lane.b32.xlu0 %v587_v43, 256  ;;  %v1217_v42 = vmul.f32 -1.442695, %v1253_v31  ;;  %v1310_v43 = vpop.eup %1309 }
  0x65   :  { %v1312_v46 = vpop.eup %1311 }
  0x66   :  { %v1314_v18 = vpop.eup %1313  ;;  %1335 = vpow2.f32 %v1217_v42  ;;  %v329_v52 = vadd.f32 1.0, %v1312_v46  ;;  %v1747_v46 = vld [vmem:[%s2339_s6] sm:$0xf] }
  0x67   :  { %v1316_v48 = vpop.eup %1315  ;;  %1337 = vpow2.f32 %v1218_v45  ;;  %v332_v54 = vadd.f32 1.0, %v1314_v18  ;;  %v1742_v45 = vld [vmem:[%s2338_s5] sm:$0xf] }
  0x68   :  { %596 = vbcast.lane.b32.xlu0 %v594_v49, 256  ;;  %973 = vbcast.lane.b32.xlu1 %v971_v12, 256  ;;  %v331_v49 = vadd.f32 1.0, %v1310_v43  ;;  %v1318_v12 = vpop.eup %1317  ;;  %1339 = vpow2.f32 %v1219_v60  ;;  %v330_v56 = vadd.f32 1.0, %v1316_v48 }
  0x69   :  { %v1320_v53 = vpop.eup %1319 }
  0x6a   :  { %v1322_v55 = vpop.eup %1321  ;;  %1341 = vrcp.f32 %v331_v49  ;;  %v333_v62 = vadd.f32 1.0, %v1320_v53 }
  0x6b   :  { %v1324_v57 = vpop.eup %1323  ;;  %1343 = vrcp.f32 %v329_v52  ;;  %v336_v1 = vadd.f32 1.0, %v1322_v55  ;;  %v79_v55 = vld [vmem:[%s2336_s3 + $0x8] sm:$0xff] }
  0x6c   :  { %603 = vbcast.lane.b32.xlu0 %v601_v58, 256  ;;  %987 = vbcast.lane.b32.xlu1 %v985_v59, 256  ;;  %v334_v58 = vadd.f32 1.0, %v1318_v12  ;;  %v1326_v59 = vpop.eup %1325  ;;  %1345 = vrcp.f32 %v332_v54  ;;  %v335_v11 = vadd.f32 1.0, %v1324_v57  ;;  %v78_v54 = vld [vmem:[%s2336_s3] sm:$0xff]  ;;  %v1083_v57 = vmul.f32 0.5, %v1742_v45 }
  0x6d   :  { %v1328_v63 = vpop.eup %1327  ;;  %1347 = vrcp.f32 %v330_v56  ;;  %v338_v37 = vadd.f32 1.0, %v1326_v59  ;;  %vm118_vm4 = vcmp.eq.s32.totalorder %v78_v54, 1  ;;  %vm116_vm5 = vcmp.eq.s32.totalorder %v78_v54, 0 }
  0x6e   :  { %v1330_v2 = vpop.eup %1329  ;;  %1349 = vrcp.f32 %v334_v58  ;;  %v337_v0 = vadd.f32 1.0, %v1328_v63  ;;  %v1089_v58 = vmul.f32 0.5, %v1747_v46  ;;  %vm117_vm6 = vcmp.eq.s32.totalorder %v79_v55, 0 }
  0x6f   :  { %1351 = vrcp.f32 %v333_v62  ;;  %v339_v10 = vadd.f32 1.0, %v1330_v2  ;;  %vm119_vm7 = vcmp.eq.s32.totalorder %v79_v55, 1  ;;  %vm128_vm9 = vcmp.le.s32.totalorder %v78_v54, 2 }
  0x70   :  { %610 = vbcast.lane.b32.xlu0 %v608_v15, 256  ;;  %1001 = vbcast.lane.b32.xlu1 %v999_v22, 256  ;;  %v1332_v15 = vpop.eup %1331  ;;  %1353 = vrcp.f32 %v336_v1  ;;  %vm129_vm11 = vcmp.le.s32.totalorder %v79_v55, 2  ;;  %vm134_vm12 = vcmp.eq.s32.totalorder %v78_v54, 2  ;;  %vm135_vm13 = vcmp.eq.s32.totalorder %v79_v55, 2 }
  0x71   :  { %v1334_v20 = vpop.eup %1333  ;;  %1355 = vrcp.f32 %v335_v11  ;;  %v340_v24 = vadd.f32 1.0, %v1332_v15  ;;  %v2342_v15 = vmov 0.0  }
  0x72   :  { %v1336_v22 = vpop.eup %1335  ;;  %1357 = vrcp.f32 %v338_v37  ;;  %v341_v40 = vadd.f32 1.0, %v1334_v20  ;;  %v1202_v37 = vsel %vm128_vm9, 1.0, %v2342_v15  ;;  %v1085_v20 = vrot.slane %v1083_v57, 2 }
  0x73   :  { %v1338_v23 = vpop.eup %1337  ;;  %1359 = vrcp.f32 %v337_v0  ;;  %v342_v30 = vadd.f32 1.0, %v1336_v22  ;;  %v1203_v0 = vsel %vm129_vm11, 1.0, %v2342_v15  ;;  %vm1133_vm11 = vcmask 1040384  }
  0x74   :  { %617 = vbcast.lane.b32.xlu0 %v615_v33, 256  ;;  %v1340_v26 = vpop.eup %1339  ;;  %1361 = vrcp.f32 %v339_v10  ;;  %v343_v33 = vadd.f32 1.0, %v1338_v23 }
  0x75   :  { %v1721_v31 = vpop.eup %1341  ;;  %1363 = vrcp.f32 %v340_v24  ;;  %v344_v36 = vadd.f32 1.0, %v1340_v26  ;;  %v1473_v24 = vmov 1.0  }
  0x76   :  { %v1723_v34 = vpop.eup %1343  ;;  %1365 = vrcp.f32 %v341_v40  ;;  %v136_v26 = vsel %vm134_vm12, 0.1, %v1473_v24  ;;  %vm1158_vm12 = vcmp.eq.s32.totalorder %v1709_v13, 1 }
  0x77   :  { %v1728_v38 = vpop.eup %1345  ;;  %1367 = vrcp.f32 %v342_v30  ;;  %v138_v30 = vmul.f32 %v1202_v37, %v136_v26 }
  0x78   :  { %952 = vbcast.lane.b32.xlu0 %v950_v44, 256  ;;  %v1734_v42 = vpop.eup %1347  ;;  %1369 = vrcp.f32 %v343_v33 }
  0x79   :  { %v1737_v44 = vpop.eup %1349  ;;  %1371 = vrcp.f32 %v344_v36  ;;  %v157_v55 = vsel %vm144_vm15, %v138_v30, 0.0 }
  0x7a   :  { %v1749_v60 = vpop.eup %1351  ;;  %1373 = vlog2.f32 %v1606_v47 }
  0x7b   :  { %v1756_v12 = vpop.eup %1353  ;;  %1375 = vlog2.f32 %v1609_v51  ;;  %v121_v51 = vsel %vm119_vm7, %v1535_v7, %v1555_v14 }
  0x7c   :  { %966 = vbcast.lane.b32.xlu0 %v964_v50, 256  ;;  %v520_v19 = vpop.permute.xlu1 %519  ;;  %v1774_v56 = vpop.eup %1355  ;;  %v123_v7 = vsel %vm117_vm6, %v1533_v6, %v121_v51 }
  0x7d   :  { %v513_v5 = vpop.permute.xlu0 %512  ;;  %vm620_vm0 = vcmp.eq.s32.totalorder %v520_v19, %v1709_v13  ;;  %v1779_v59 = vpop.eup %1357  ;;  %v120_v19 = vsel %vm118_vm4, %v1528_v4, %v1540_v9  ;;  %v125_v23 = vsub.f32 %v123_v7, %v1581_v25  ;;  %v140_v25 = vsub.f32 0.0, %v138_v30 }
  0x7e   :  { %vm619_vm1 = vcmp.eq.s32.totalorder %v513_v5, %v1709_v13  ;;  %v1716_v28 = vsel %vm620_vm0, 0.90416664, %v2344_v27  ;;  %v1783_v62 = vpop.eup %1359  ;;  %v122_v5 = vsel %vm116_vm5, %v1526_v3, %v120_v19 }
  0x7f   :  { %v1719_v29 = vsel %vm619_vm1, 0.90416664, %v2344_v27  ;;  %v1726_v35 = vsub.f32 1.0, %v1716_v28  ;;  %v796_v18 = vmul.f32 0.25, %v1716_v28  ;;  %v1790_v63 = vpop.eup %1361  ;;  %v124_v10 = vsub.f32 %v122_v5, %v1563_v17 }
  0x80   :  { %980 = vbcast.lane.b32.xlu0 %v978_v61, 256  ;;  %v527_v21 = vpop.permute.xlu1 %526  ;;  %v1732_v41 = vsub.f32 1.0, %v1719_v29  ;;  %v1762_v52 = vmul.f32 0.25, %v1719_v29  ;;  %v1802_v9 = vpop.eup %1363 }
  0x81   :  { %vm621_vm2 = vcmp.eq.s32.totalorder %v527_v21, %v1709_v13  ;;  %v812_v48 = vmul.f32 0.75, %v1726_v35  ;;  %v1806_v14 = vpop.eup %1365 }
  0x82   :  { %2368 = vst [vmem:[#allocation7_spill] sm:$0xff] %v1732_v41  ;;  %v1754_v49 = vsel %vm621_vm2, 0.90416664, %v2344_v27  ;;  %v1765_v53 = vmul.f32 0.75, %v1732_v41  ;;  %v1812_v21 = vpop.eup %1367  ;;  %vm1019_vm2 = vcmask 195584  }
  0x83   :  { %v1785_v47 = vadd.f32 %v812_v48, %v796_v18  ;;  %v1793_v1 = vsub.f32 1.0, %v1754_v49  ;;  %v1796_v2 = vmul.f32 0.25, %v1754_v49  ;;  %v1815_v3 = vpop.eup %1369  ;;  %v1088_v18 = vadd.f32 %v1085_v20, %v1742_v45 }
  0x84   :  { %994 = vbcast.lane.b32.xlu0 %v992_v32, 256  ;;  %v534_v39 = vpop.permute.xlu1 %533  ;;  %v1091_v32 = vrot.slane %v1089_v58, 2  ;;  %v1824_v40 = vpop.eup %1371 }
  0x85   :  { %vm622_vm3 = vcmp.eq.s32.totalorder %v534_v39, %v1709_v13  ;;  %v137_v39 = vsel %vm135_vm13, 0.1, %v1473_v24  ;;  %v1374_v33 = vpop.eup %1373  ;;  %vm1153_vm13 = vcmp.eq.s32.totalorder %v1709_v13, 0 }
  0x86   :  { %v1759_v50 = vsel %vm622_vm3, 0.90416664, %v2344_v27  ;;  %v139_v36 = vmul.f32 %v1203_v0, %v137_v39  ;;  %v1093_v48 = vsub.f32 %v1747_v46, %v1091_v32  ;;  %v1376_v17 = vpop.eup %1375  ;;  %v113_v54 = vmul.f32 0.6931472, %v1374_v33 }
  0x87   :  { %v1799_v4 = vsub.f32 1.0, %v1759_v50  ;;  %v1094_v57 = vadd.f32 %v1091_v32, %v1747_v46  ;;  %v813_v32 = vmul.f32 0.75, %v1793_v1  ;;  %v798_v33 = vmul.f32 0.25, %v1759_v50 }
  0x88   :  { %v541_v43 = vpop.permute.xlu1 %540  ;;  %v141_v19 = vsub.f32 0.0, %v139_v36  ;;  %v158_v51 = vsel %vm144_vm15, %v139_v36, 0.0  ;;  %v126_v5 = vsub.f32 %v124_v10, %v113_v54 }
  0x89   :  { %vm623_vm8 = vcmp.eq.s32.totalorder %v541_v43, %v1709_v13  ;;  %v1087_v43 = vsub.f32 %v1742_v45, %v1085_v20  ;;  %v159_v7 = vadd.f32 %v158_v51, %v157_v55  ;;  %v1100_v45 = vsub.f32 %v1094_v57, %v1093_v48 }
  0x8a   :  { %v1809_v11 = vsel %vm623_vm8, 0.90416664, %v2344_v27  ;;  %v1105_v0 = vmin.f32 %v1088_v18, %v1094_v57  ;;  %v1118_v24 = vmax.f32 %v1088_v18, %v1094_v57  ;;  %v142_v26 = vmul.f32 %v140_v25, %v126_v5 }
  0x8b   :  { %v1095_v37 = vsub.f32 %v1088_v18, %v1087_v43  ;;  %v1102_v30 = vrot.slane %v1100_v45, 1  ;;  %v1119_v46 = vmin.f32 %v1087_v43, %v1093_v48  ;;  %v1839_v10 = vsub.f32 1.0, %v1809_v11 }
  0x8c   :  { %v548_v61 = vpop.permute.xlu1 %547  ;;  %v814_v54 = vmul.f32 0.75, %v1799_v4  ;;  %v799_v55 = vmul.f32 0.25, %v1809_v11 }
  0x8d   :  { %vm624_vm10 = vcmp.eq.s32.totalorder %v548_v61, %v1709_v13  ;;  %v115_v61 = vmul.f32 0.6931472, %v1376_v17  ;;  %v1097_v39 = vrot.slane %v1095_v37, 1  ;;  %v1120_v18 = vsub.f32 %v1118_v24, %v1119_v46 }
  0x8e   :  { %v1820_v6 = vsel %vm624_vm10, 0.90416664, %v2344_v27  ;;  %v1104_v51 = vmul.f32 %v1102_v30, %v1100_v45  ;;  %v815_v24 = vmul.f32 0.75, %v1839_v10  ;;  %vm1072_vm10 = vcmask 1043456  }
  0x8f   :  { %v127_v20 = vsub.f32 %v125_v23, %v115_v61  ;;  %v1842_v36 = vsub.f32 1.0, %v1820_v6  ;;  %v145_v23 = vsel %vm144_vm15, %v142_v26, 0.0  ;;  %v1121_v5 = vmax.f32 %v1120_v18, 0.0 }
  0x90   :  { %v555_v22 = vpop.permute.xlu1 %554  ;;  %v800_v26 = vmul.f32 0.25, %v1820_v6 }
  0x91   :  { %vm625_vm14 = vcmp.eq.s32.totalorder %v555_v22, %v1709_v13  ;;  %v1106_v22 = vmax.f32 %v1087_v43, %v1093_v48  ;;  %v143_v17 = vmul.f32 %v141_v19, %v127_v20  ;;  %v1099_v19 = vmul.f32 %v1097_v39, %v1095_v37 }
  0x92   :  { %v1833_v58 = vsel %vm625_vm14, 0.90416664, %v2344_v27  ;;  %v816_v46 = vmul.f32 0.75, %v1842_v36  ;;  %v1859_v39 = vadd.f32 %v813_v32, %v1796_v2  ;;  %v1871_v2 = vadd.f32 %v815_v24, %v799_v55 }
  0x93   :  { %v1107_v15 = vsub.f32 %v1105_v0, %v1106_v22  ;;  %v1847_v25 = vsub.f32 1.0, %v1833_v58  ;;  %v146_v43 = vsel %vm144_vm15, %v143_v17, 0.0  ;;  %v801_v17 = vmul.f32 0.25, %v1833_v58 }
  0x94   :  { %160 = vadd.xlane.f32.xlu1 %v159_v7  ;;  %v147_v0 = vadd.f32 %v146_v43, %v145_v23  ;;  %v1113_v18 = vadd.f32 %v1104_v51, %v1099_v19  ;;  %v1873_v32 = vadd.f32 %v816_v46, %v800_v26  ;;  %vm1164_vm14 = vcmp.eq.s32.totalorder %v1709_v13, 2 }
  0x95   :  { %v1108_v48 = vmax.f32 %v1107_v15, 0.0  ;;  %v1123_v15 = vrot.slane %v1121_v5, 1  ;;  %v817_v27 = vmul.f32 0.75, %v1847_v25  ;;  %vm1170_vm15 = vcmp.eq.s32.totalorder %v1709_v13, 3 }
  0x97   :  { %v1110_v22 = vrot.slane %v1108_v48, 1 }
  0x99   :  { %v1865_v23 = vmul.f32 %v1110_v22, %v1108_v48 }
  0x9b   :  { %2370 = vst [vmem:[#allocation9_spill] sm:$0xff] %v1865_v23 }
  0x9e   :  { %v189_v57 = vpop.permute.xlu1 %188  ;;  %v175_v61 = vpop.permute.xlu0 %174 }
  0x9f   :  { %v379_v7 = vmul.f32 %v1721_v31, %v189_v57  ;;  %v377_v20 = vmul.f32 %v1723_v34, %v175_v61  ;;  %v1863_v31 = vadd.f32 %v1765_v53, %v1762_v52  ;;  %v1875_v52 = vmul.f32 %v1123_v15, %v1121_v5 }
  0xa0   :  { %v1877_v53 = vadd.f32 %v817_v27, %v801_v17 }
  0xa1   :  { %v395_v37 = vmax.f32 %v379_v7, 1e-05  ;;  %v393_v45 = vmax.f32 %v377_v20, 1e-05  ;;  %2369 = vst [vmem:[#allocation8_spill] sm:$0xff] %v1863_v31  ;;  %v1869_v7 = vadd.f32 %v814_v54, %v798_v33  ;;  %2371 = vst [vmem:[#allocation10_spill] sm:$0xff] %v1875_v52 }
  0xa2   :  { %v196_v34 = vpop.permute.xlu1 %195  ;;  %v182_v30 = vpop.permute.xlu0 %181  ;;  %2372 = vst [vmem:[#allocation11_spill] sm:$0xff] %v1877_v53 }
  0xa3   :  { %v411_v43 = vmin.f32 %v395_v37, 0.99999  ;;  %v409_v57 = vmin.f32 %v393_v45, 0.99999  ;;  %v380_v61 = vmul.f32 %v1728_v38, %v196_v34  ;;  %v378_v8 = vmul.f32 %v1734_v42, %v182_v30  ;;  %148 = vadd.xlane.f32.xlu0 %v147_v0 }
  0xa4   :  { %v1880_v42 = vsub.f32 %v1113_v18, %v1865_v23 }
  0xa5   :  { %1377 = vlog2.f32 %v411_v43  ;;  %v459_v48 = vsub.f32 1.0, %v411_v43  ;;  %v457_v19 = vsub.f32 1.0, %v409_v57  ;;  %v396_v51 = vmax.f32 %v380_v61, 1e-05 }
  0xa6   :  { %1379 = vlog2.f32 %v409_v57  ;;  %v394_v20 = vmax.f32 %v378_v8, 1e-05  ;;  %v210_v38 = vpop.permute.xlu1 %209  ;;  %v203_v22 = vpop.permute.xlu0 %202  ;;  %2373 = vst [vmem:[#allocation12_spill] sm:$0xff] %v1880_v42  ;;  %v733_v8 = vmul.f32 %v1754_v49, %v411_v43  ;;  %v1890_v24 = vmul.f32 %v1719_v29, %v409_v57 }
  0xa7   :  { %1381 = vlog2.f32 %v459_v48  ;;  %v382_v33 = vmul.f32 %v1737_v44, %v210_v38  ;;  %v381_v54 = vmul.f32 %v1749_v60, %v203_v22  ;;  %v749_v55 = vmul.f32 %v1793_v1, %v459_v48 }
  0xa8   :  { %1383 = vlog2.f32 %v457_v19  ;;  %v1885_v27 = vmin.f32 %v396_v51, 0.99999  ;;  %v410_v5 = vmin.f32 %v394_v20, 0.99999  ;;  %2374 = vst [vmem:[#allocation13_spill] sm:$0xff] %v1890_v24  ;;  %v1895_v37 = vmul.f32 %v1732_v41, %v457_v19 }
  0xa9   :  { %v398_v26 = vmax.f32 %v382_v33, 1e-05  ;;  %v397_v46 = vmax.f32 %v381_v54, 1e-05  ;;  %v1901_v30 = vadd.f32 %v749_v55, %v733_v8 }
  0xaa   :  { %1385 = vlog2.f32 %v1885_v27  ;;  %v2351_v44 = vsub.f32 1.0, %v1885_v27  ;;  %v458_v60 = vsub.f32 1.0, %v410_v5  ;;  %v224_v15 = vpop.permute.xlu1 %223  ;;  %v217_v17 = vpop.permute.xlu0 %216  ;;  %2375 = vst [vmem:[#allocation14_spill] sm:$0xff] %v1895_v37  ;;  %v1910_v61 = vmul.f32 %v1759_v50, %v1885_v27 }
  0xab   :  { %1387 = vlog2.f32 %v410_v5  ;;  %v1897_v45 = vmin.f32 %v398_v26, 0.99999  ;;  %v1899_v34 = vmin.f32 %v397_v46, 0.99999  ;;  %v384_v18 = vmul.f32 %v1756_v12, %v224_v15 }
  0xac   :  { %1389 = vlog2.f32 %v2351_v44  ;;  %v383_v43 = vmul.f32 %v1774_v56, %v217_v17  ;;  %v748_v12 = vmul.f32 %v1726_v35, %v458_v60  ;;  %v732_v33 = vmul.f32 %v1716_v28, %v410_v5 }
  0xad   :  { %1391 = vlog2.f32 %v458_v60  ;;  %v2347_v48 = vsub.f32 1.0, %v1897_v45  ;;  %v2348_v19 = vsub.f32 1.0, %v1899_v34  ;;  %v400_v51 = vmax.f32 %v384_v18, 1e-05 }
  0xae   :  { %1393 = vlog2.f32 %v1897_v45  ;;  %v399_v20 = vmax.f32 %v383_v43, 1e-05  ;;  %v238_v38 = vpop.permute.xlu1 %237  ;;  %v231_v22 = vpop.permute.xlu0 %230  ;;  %v1928_v60 = vmul.f32 %v1820_v6, %v1897_v45 }
  0xaf   :  { %v1378_v56 = vpop.eup %1377  ;;  %1395 = vlog2.f32 %v2347_v48  ;;  %v386_v54 = vmul.f32 %v1779_v59, %v238_v38  ;;  %v385_v55 = vmul.f32 %v1783_v62, %v231_v22  ;;  %v1922_v46 = vmin.f32 %v400_v51, 0.99999 }
  0xb0   :  { %v1380_v8 = vpop.eup %1379  ;;  %v430_v26 = vmul.f32 0.6931472, %v1378_v56  ;;  %1397 = vlog2.f32 %v1899_v34  ;;  %v1924_v15 = vmin.f32 %v399_v20, 0.99999  ;;  %v1934_v62 = vmul.f32 %v1809_v11, %v1899_v34 }
  0xb1   :  { %2376 = vst [vmem:[#allocation15_spill] sm:$0xff] %v1922_v46  ;;  %v1382_v17 = vpop.eup %1381  ;;  %1399 = vlog2.f32 %v2348_v19  ;;  %v402_v5 = vmax.f32 %v386_v54, 1e-05  ;;  %v401_v59 = vmax.f32 %v385_v55, 1e-05  ;;  %v2349_v43 = vsub.f32 1.0, %v1922_v46 }
  0xb2   :  { %v1384_v18 = vpop.eup %1383  ;;  %1401 = vlog2.f32 %v1922_v46  ;;  %v562_v51 = vpop.permute.xlu1 %561  ;;  %v1938_v38 = vadd.f32 %v748_v12, %v732_v33  ;;  %v1940_v22 = vmul.f32 0.6931472, %v1382_v17  ;;  %v426_v56 = vmul.f32 0.6931472, %v1380_v8 }
  0xb3   :  { %v245_v20 = vpop.permute.xlu0 %244  ;;  %1403 = vlog2.f32 %v1924_v15  ;;  %v2350_v54 = vsub.f32 1.0, %v1924_v15  ;;  %v1945_v0 = vmul.f32 %v1754_v49, %v430_v26  ;;  %v1949_v57 = vmin.f32 %v402_v5, 0.99999 }
  0xb4   :  { %v1386_v55 = vpop.eup %1385  ;;  %1405 = vlog2.f32 %v2349_v43  ;;  %v1951_v48 = vmin.f32 %v401_v59, 0.99999  ;;  %v1953_v33 = vmul.f32 0.6931472, %v1384_v18  ;;  %vm626_vm0 = vcmp.eq.s32.totalorder %v562_v51, %v1709_v13 }
  0xb5   :  { %v1388_v12 = vpop.eup %1387  ;;  %v432_v17 = vmul.f32 0.6931472, %v1386_v55  ;;  %1407 = vlog2.f32 %v2350_v54  ;;  %v387_v26 = vmul.f32 %v1790_v63, %v245_v20  ;;  %v1962_v43 = vmul.f32 %v1719_v29, %v426_v56 }
  0xb6   :  { %2377 = vst [vmem:[#allocation16_spill] sm:$0xff] %v1951_v48  ;;  %2378 = vst [vmem:[#allocation17_spill] sm:$0xff] %v1953_v33  ;;  %v1390_v8 = vpop.eup %1389  ;;  %v428_v19 = vmul.f32 0.6931472, %v1388_v12  ;;  %1409 = vlog2.f32 %v1949_v57  ;;  %v1966_v18 = vmul.f32 %v1833_v58, %v1924_v15  ;;  %v2381_v51 = vmov 0.004166667   ;;  %v576_v29 = vpop.permute.xlu1 %575 }
  0xb7   :  { %v252_v5 = vpop.permute.xlu0 %251  ;;  %v1392_v59 = vpop.eup %1391  ;;  %2379 = vst [vmem:[#allocation18_spill] sm:$0xff] %v1962_v43  ;;  %v642_v54 = vsel %vm626_vm0, 0.90416664, %v2381_v51  ;;  %v1970_v44 = vmul.f32 0.6931472, %v1390_v8  ;;  %v1973_v49 = vmul.f32 %v1759_v50, %v432_v17  ;;  %v2382_v63 = vsub.f32 1.0, %v1949_v57 }
  0xb8   :  { %2380 = vst [vmem:[#allocation19_spill] sm:$0xff] %v1966_v18  ;;  %v1394_v12 = vpop.eup %1393  ;;  %v1977_v20 = vsub.f32 1.0, %v642_v54  ;;  %v476_v23 = vmul.f32 0.6931472, %v1392_v59  ;;  %v802_v55 = vmul.f32 0.25, %v642_v54  ;;  %v652_v42 = vmul.f32 %v1716_v28, %v428_v19 }
  0xb9   :  { %1411 = vlog2.f32 %v2382_v63  ;;  %v1396_v56 = vpop.eup %1395  ;;  %v436_v16 = vmul.f32 0.6931472, %v1394_v12  ;;  %v403_v31 = vmax.f32 %v387_v26, 1e-05  ;;  %vm628_vm1 = vcmp.eq.s32.totalorder %v576_v29, %v1709_v13 }
  0xba   :  { %1413 = vlog2.f32 %v1951_v48  ;;  %v1398_v52 = vpop.eup %1397  ;;  %v818_v8 = vmul.f32 0.75, %v1977_v20  ;;  %v2383_v53 = vsub.f32 1.0, %v1951_v48  ;;  %v644_v59 = vsel %vm628_vm1, 0.90416664, %v2381_v51 }
  0xbb   :  { %v259_v50 = vpop.permute.xlu0 %258  ;;  %v1400_v17 = vpop.eup %1399  ;;  %v434_v63 = vmul.f32 0.6931472, %v1398_v52  ;;  %v388_v12 = vmul.f32 %v1802_v9, %v252_v5  ;;  %v1987_v24 = vmul.f32 0.6931472, %v1396_v56  ;;  %v1990_v28 = vmul.f32 %v1820_v6, %v436_v16 }
  0xbc   :  { %1415 = vlog2.f32 %v2383_v53  ;;  %v1402_v37 = vpop.eup %1401  ;;  %v1993_v19 = vmul.f32 %v642_v54, %v1922_v46  ;;  %v1995_v26 = vmin.f32 %v403_v31, 0.99999  ;;  %v1997_v52 = vmul.f32 0.6931472, %v1400_v17  ;;  %v2007_v46 = vpop.permute.xlu1 %903 }
  0xbd   :  { %v1404_v29 = vpop.eup %1403  ;;  %v440_v43 = vmul.f32 0.6931472, %v1402_v37  ;;  %v1999_v53 = vadd.f32 %v818_v8, %v802_v55  ;;  %v2001_v18 = vsub.f32 1.0, %v644_v59  ;;  %v2004_v5 = vmul.f32 %v1809_v11, %v434_v63 }
  0xbe   :  { %2384 = vst [vmem:[#allocation20_spill] sm:$0xff] %v1993_v19  ;;  %2385 = vst [vmem:[#allocation21_spill] sm:$0xff] %v1995_v26  ;;  %v1406_v9 = vpop.eup %1405  ;;  %v438_v56 = vmul.f32 0.6931472, %v1404_v29  ;;  %v804_v6 = vmul.f32 0.25, %v644_v59  ;;  %v684_v55 = vmul.f32 %v1726_v35, %v476_v23  ;;  %1417 = vlog2.f32 %v1995_v26 }
  0xbf   :  { %2386 = vst [vmem:[#allocation22_spill] sm:$0xff] %v1999_v53  ;;  %v266_v31 = vpop.permute.xlu0 %265  ;;  %v1408_v19 = vpop.eup %1407  ;;  %v488_v48 = vmul.f32 0.6931472, %v1406_v9  ;;  %v820_v17 = vmul.f32 0.75, %v2001_v18  ;;  %v404_v37 = vmax.f32 %v388_v12, 1e-05  ;;  %v658_v41 = vmul.f32 %v642_v54, %v440_v43 }
  0xc0   :  { %v1410_v8 = vpop.eup %1409  ;;  %v2011_v53 = vmul.f32 0.6931472, %v1408_v19  ;;  %v2015_v11 = vmul.f32 %v644_v59, %v1949_v57  ;;  %v700_v9 = vadd.f32 %v684_v55, %v652_v42  ;;  %v2021_v12 = vmul.f32 %v1833_v58, %v438_v56 }
  0xc1   :  { %v690_v63 = vmul.f32 %v1977_v20, %v488_v48  ;;  %v444_v29 = vmul.f32 0.6931472, %v1410_v8  ;;  %v2018_v16 = vmin.f32 %v404_v37, 0.99999  ;;  %v2387_v35 = vsub.f32 1.0, %v1995_v26  ;;  %v911_v26 = vpop.permute.xlu1 %910 }
  0xc2   :  { %v389_v23 = vmul.f32 %v1806_v14, %v259_v50  ;;  %v685_v43 = vmul.f32 %v1793_v1, %v1940_v22  ;;  %v2030_v8 = vadd.f32 %v820_v17, %v804_v6  ;;  %v780_v42 = vsub.f32 1.0, %v1938_v38 }
  0xc3   :  { %v1412_v33 = vpop.eup %1411  ;;  %1419 = vlog2.f32 %v2387_v35  ;;  %v273_v54 = vpop.permute.xlu0 %272  ;;  %v781_v37 = vsub.f32 1.0, %v1901_v30  ;;  %v660_v58 = vmul.f32 %v644_v59, %v444_v29  ;;  %v468_v56 = vsub.f32 1.0, %v2018_v16 }
  0xc4   :  { %v2028_v19 = vpop.eup %1413  ;;  %v492_v48 = vmul.f32 0.6931472, %v1412_v33  ;;  %v716_v55 = vsub.f32 0.0, %v700_v9  ;;  %v405_v35 = vmax.f32 %v389_v23, 1e-05  ;;  %v2035_v50 = vadd.f32 %v690_v63, %v658_v41 }
  0xc5   :  { %v701_v22 = vadd.f32 %v685_v43, %v1945_v0  ;;  %v390_v33 = vmul.f32 %v1812_v21, %v266_v31  ;;  %1421 = vlog2.f32 %v468_v56  ;;  %v686_v59 = vmul.f32 %v1799_v4, %v1970_v44 }
  0xc6   :  { %v1416_v14 = vpop.eup %1415  ;;  %v692_v1 = vmul.f32 %v2001_v18, %v492_v48  ;;  %v844_v30 = vmul.f32 %v1785_v47, %v716_v55  ;;  %v2043_v38 = vmin.f32 %v405_v35, 0.99999  ;;  %1423 = vlog2.f32 %v2018_v16 }
  0xc7   :  { %v280_v6 = vpop.permute.xlu0 %279  ;;  %v717_v41 = vsub.f32 0.0, %v701_v22  ;;  %v406_v17 = vmax.f32 %v390_v33, 1e-05  ;;  %v2388_v63 = vsub.f32 1.0, %v1885_v27  ;;  %v702_v29 = vadd.f32 %v686_v59, %v1973_v49 }
  0xc8   :  { %v2051_v21 = vadd.f32 %v692_v1, %v660_v58  ;;  %v860_v31 = vmul.f32 %v844_v30, %v780_v42  ;;  %v469_v47 = vsub.f32 1.0, %v2043_v38  ;;  %v2055_v9 = vmul.f32 0.6931472, %v1416_v14  ;;  %v2061_v48 = vpop.eup %1417 }
  0xc9   :  { %v750_v0 = vmul.f32 %v1799_v4, %v2388_v63  ;;  %v845_v44 = vmul.f32 %v1859_v39, %v717_v41  ;;  %v2058_v23 = vmin.f32 %v406_v17, 0.99999  ;;  %v918_v4 = vpop.permute.xlu1 %917  ;;  %v718_v58 = vsub.f32 0.0, %v702_v29 }
  0xca   :  { %v876_v27 = vmul.f32 %v860_v31, %v780_v42  ;;  %1425 = vlog2.f32 %v469_v47  ;;  %v391_v55 = vmul.f32 %v1815_v3, %v273_v54  ;;  %v722_v49 = vsub.f32 0.0, %v2035_v50 }
  0xcb   :  { %v766_v43 = vadd.f32 %v750_v0, %v1910_v61  ;;  %v569_v35 = vpop.permute.xlu0 %568  ;;  %1427 = vlog2.f32 %v2043_v38  ;;  %v861_v39 = vmul.f32 %v845_v44, %v781_v37  ;;  %v470_v14 = vsub.f32 1.0, %v2058_v23 }
  0xcc   :  { %v724_v61 = vsub.f32 0.0, %v2051_v21  ;;  %v846_v42 = vmul.f32 %v1869_v7, %v718_v58  ;;  %v407_v33 = vmax.f32 %v391_v55, 1e-05  ;;  %v1004_v30 = vmul.f32 %v2007_v46, %v876_v27 }
  0xcd   :  { %v1420_v1 = vpop.eup %1419  ;;  %v782_v22 = vsub.f32 1.0, %v766_v43  ;;  %v877_v59 = vmul.f32 %v861_v39, %v781_v37  ;;  %v687_v3 = vmul.f32 %v1839_v10, %v1997_v52  ;;  %v2389_v54 = vsub.f32 1.0, %v1899_v34  ;;  %v925_v44 = vpop.permute.xlu1 %924 }
  0xce   :  { %1429 = vlog2.f32 %v2058_v23  ;;  %v2078_v63 = vmin.f32 %v407_v33, 0.99999  ;;  %v392_v0 = vmul.f32 %v1824_v40, %v280_v6  ;;  %v688_v34 = vmul.f32 %v1842_v36, %v1987_v24 }
  0xcf   :  { %v751_v41 = vmul.f32 %v1839_v10, %v2389_v54  ;;  %v862_v17 = vmul.f32 %v846_v42, %v782_v22  ;;  %v2081_v31 = vpop.permute.xlu0 %896  ;;  %1431 = vlog2.f32 %v470_v14  ;;  %v703_v7 = vadd.f32 %v687_v3, %v2004_v5  ;;  %v1422_v10 = vpop.eup %1421 }
  0xd0   :  { %v1005_v52 = vmul.f32 %v911_v26, %v877_v59  ;;  %v2364_v29 = vsub.f32 1.0, %v2078_v63  ;;  %v408_v43 = vmax.f32 %v392_v0, 1e-05  ;;  %v2090_v40 = vpop.eup %1423  ;;  %v2092_v6 = vmul.f32 0.6931472, %v1420_v1 }
  0xd1   :  { %v767_v46 = vadd.f32 %v751_v41, %v1934_v62  ;;  %v878_v37 = vmul.f32 %v862_v17, %v782_v22  ;;  %v2095_v27 = vsel %vm1019_vm2, %v1004_v30, 0.0  ;;  %1433 = vlog2.f32 %v2078_v63  ;;  %v932_v54 = vpop.permute.xlu1 %931 }
  0xd2   :  { %v719_v62 = vsub.f32 0.0, %v703_v7  ;;  %v2098_v5 = vmul.f32 0.6931472, %v1422_v10  ;;  %v2100_v58 = vmin.f32 %v408_v43, 0.99999  ;;  %v704_v26 = vadd.f32 %v688_v34, %v1990_v28 }
  0xd3   :  { %v1006_v24 = vmul.f32 %v918_v4, %v878_v37  ;;  %v2103_v55 = vpop.permute.xlu0 %582  ;;  %v783_v39 = vsub.f32 1.0, %v767_v46  ;;  %v2390_v1 = vsub.f32 1.0, %v1897_v45  ;;  %vm627_vm3 = vcmp.eq.s32.totalorder %v569_v35, %v1709_v13 }
  0xd4   :  { %v847_v22 = vmul.f32 %v1871_v2, %v719_v62  ;;  %v1426_v33 = vpop.eup %1425  ;;  %v2111_v30 = vsel %vm1019_vm2, %v1005_v52, 0.0  ;;  %1435 = vlog2.f32 %v2364_v29  ;;  %v2365_v28 = vsub.f32 1.0, %v2100_v58 }
  0xd5   :  { %v752_v42 = vmul.f32 %v1842_v36, %v2390_v1  ;;  %v720_v4 = vsub.f32 0.0, %v704_v26  ;;  %v2116_v59 = vpop.eup %1427  ;;  %v442_v45 = vmul.f32 0.6931472, %v2028_v19  ;;  %v643_v36 = vsel %vm627_vm3, 0.90416664, %v2381_v51 }
  0xd6   :  { %v863_v3 = vmul.f32 %v847_v22, %v783_v39  ;;  %v2122_v35 = vsel %vm1019_vm2, %v1006_v24, 0.0  ;;  %1437 = vlog2.f32 %v2100_v58  ;;  %v2126_v17 = vsub.f32 1.0, %v643_v36  ;;  %v2393_v22 = vld [vmem:[#allocation7_spill] sm:$0xff] }
  0xd7   :  { %v768_v2 = vadd.f32 %v752_v42, %v1928_v60  ;;  %v848_v41 = vmul.f32 %v1873_v32, %v720_v4  ;;  %v2128_v0 = vpop.permute.xlu0 %589  ;;  %v2130_v7 = vmul.f32 0.6931472, %v1426_v33  ;;  %1439 = vlog2.f32 %v2365_v28  ;;  %v2394_v33 = vld [vmem:[#allocation16_spill] sm:$0xff] }
  0xd8   :  { %v879_v46 = vmul.f32 %v863_v3, %v783_v39  ;;  %v2134_v19 = vpop.eup %1429  ;;  %v659_v34 = vmul.f32 %v643_v36, %v442_v45  ;;  %v691_v10 = vmul.f32 %v2126_v17, %v2055_v9  ;;  %v819_v52 = vmul.f32 0.75, %v2126_v17  ;;  %v2392_v39 = vld [vmem:[#allocation17_spill] sm:$0xff]  ;;  %v2404_v28 = vld [vmem:[#allocation8_spill] sm:$0xff] }
  0xd9   :  { %v784_v60 = vsub.f32 1.0, %v768_v2  ;;  %v689_v32 = vmul.f32 %v1847_v25, %v2011_v53  ;;  %v1432_v37 = vpop.eup %1431  ;;  %v2391_v24 = vsub.f32 1.0, %v1924_v15  ;;  %v683_v1 = vmul.f32 %v2393_v22, %v2392_v39  ;;  %v939_v39 = vpop.permute.xlu1 %938  ;;  %v2399_v22 = vld [vmem:[#allocation15_spill] sm:$0xff] }
  0xda   :  { %v1007_v43 = vmul.f32 %v925_v44, %v879_v46  ;;  %v2146_v42 = vadd.f32 %v691_v10, %v659_v34  ;;  %v2149_v4 = vmul.f32 %v643_v36, %v2394_v33  ;;  %v803_v9 = vmul.f32 0.25, %v643_v36  ;;  %v2395_v44 = vld [vmem:[#allocation19_spill] sm:$0xff]  ;;  %v2397_v46 = vld [vmem:[#allocation13_spill] sm:$0xff] }
  0xdb   :  { %v864_v62 = vmul.f32 %v848_v41, %v784_v60  ;;  %v753_v26 = vmul.f32 %v1847_v25, %v2391_v24  ;;  %v705_v3 = vadd.f32 %v689_v32, %v2021_v12  ;;  %v2152_v2 = vpop.eup %1433  ;;  %v2396_v41 = vld [vmem:[#allocation18_spill] sm:$0xff]  ;;  %v2158_v29 = vpop.permute.xlu0 %596  ;;  %v2160_v34 = vmul.f32 0.6931472, %v1432_v37 }
  0xdc   :  { %v699_v15 = vadd.f32 %v683_v1, %v2396_v41  ;;  %v2398_v25 = vld [vmem:[#allocation14_spill] sm:$0xff]  ;;  %v2162_v10 = vadd.f32 %v819_v52, %v803_v9  ;;  %v2400_v12 = vsub.f32 1.0, %v2399_v22  ;;  %vm629_vm4 = vcmp.eq.s32.totalorder %v2103_v55, %v1709_v13 }
  0xdd   :  { %v880_v53 = vmul.f32 %v864_v62, %v784_v60  ;;  %v769_v45 = vadd.f32 %v753_v26, %v2395_v44  ;;  %v763_v24 = vadd.f32 %v2398_v25, %v2397_v46  ;;  %v721_v36 = vsub.f32 0.0, %v705_v3  ;;  %v2401_v46 = vld [vmem:[#allocation11_spill] sm:$0xff]  ;;  %v2402_v25 = vld [vmem:[#allocation20_spill] sm:$0xff]  ;;  %v2403_v9 = vld [vmem:[#allocation22_spill] sm:$0xff] }
  0xde   :  { %v754_v32 = vmul.f32 %v1977_v20, %v2400_v12  ;;  %v2168_v60 = vsel %vm1019_vm2, %v1007_v43, 0.0  ;;  %v723_v26 = vsub.f32 0.0, %v2146_v42  ;;  %v715_v1 = vsub.f32 0.0, %v699_v15  ;;  %v1436_v44 = vpop.eup %1435 }
  0xdf   :  { %v1008_v62 = vmul.f32 %v932_v54, %v880_v53  ;;  %v785_v41 = vsub.f32 1.0, %v769_v45  ;;  %v849_v37 = vmul.f32 %v2401_v46, %v721_v36  ;;  %v850_v3 = vmul.f32 %v2403_v9, %v722_v49 }
  0xe0   :  { %v770_v52 = vadd.f32 %v754_v32, %v2402_v25  ;;  %v779_v22 = vsub.f32 1.0, %v763_v24  ;;  %v843_v20 = vmul.f32 %v2404_v28, %v715_v1  ;;  %v2405_v54 = vsub.f32 1.0, %v1949_v57  ;;  %v2182_v53 = vpop.eup %1437  ;;  %v604_v57 = vpop.permute.xlu0 %603 }
  0xe1   :  { %v865_v45 = vmul.f32 %v849_v37, %v785_v41  ;;  %v446_v36 = vmul.f32 0.6931472, %v2061_v48  ;;  %v645_v50 = vsel %vm629_vm4, 0.90416664, %v2381_v51  ;;  %v1440_v12 = vpop.eup %1439  ;;  %v2186_v49 = vmul.f32 0.6931472, %v1436_v44 }
  0xe2   :  { %v756_v43 = vmul.f32 %v2001_v18, %v2405_v54  ;;  %v786_v15 = vsub.f32 1.0, %v770_v52  ;;  %v2189_v28 = vsel %vm1019_vm2, %v1008_v62, 0.0  ;;  %v859_v24 = vmul.f32 %v843_v20, %v779_v22  ;;  %v946_v18 = vpop.permute.xlu1 %945 }
  0xe3   :  { %v2191_v55 = vsub.f32 1.0, %v645_v50  ;;  %v881_v32 = vmul.f32 %v865_v45, %v785_v41  ;;  %v661_v46 = vmul.f32 %v645_v50, %v446_v36  ;;  %v852_v48 = vmul.f32 %v2030_v8, %v724_v61 }
  0xe4   :  { %v866_v1 = vmul.f32 %v850_v3, %v786_v15  ;;  %v875_v37 = vmul.f32 %v859_v24, %v779_v22  ;;  %v772_v62 = vadd.f32 %v756_v43, %v2015_v11  ;;  %v2200_v52 = vmul.f32 0.6931472, %v1440_v12  ;;  %v2406_v22 = vld [vmem:[#allocation21_spill] sm:$0xff] }
  0xe5   :  { %v693_v44 = vmul.f32 %v2191_v55, %v2092_v6  ;;  %v821_v25 = vmul.f32 0.75, %v2191_v55  ;;  %v1009_v9 = vmul.f32 %v939_v39, %v881_v32  ;;  %vm630_vm5 = vcmp.eq.s32.totalorder %v2128_v0, %v1709_v13 }
  0xe6   :  { %v882_v20 = vmul.f32 %v866_v1, %v786_v15  ;;  %v1003_v41 = vmul.f32 %v2081_v31, %v875_v37  ;;  %v805_v8 = vmul.f32 0.25, %v645_v50  ;;  %v788_v61 = vsub.f32 1.0, %v772_v62  ;;  %v611_v31 = vpop.permute.xlu0 %610  ;;  %v960_v12 = vpop.permute.xlu1 %959 }
  0xe7   :  { %v2205_v21 = vadd.f32 %v693_v44, %v661_v46  ;;  %v2208_v6 = vmul.f32 %v645_v50, %v2406_v22  ;;  %v448_v54 = vmul.f32 0.6931472, %v2090_v40  ;;  %v646_v11 = vsel %vm630_vm5, 0.90416664, %v2381_v51 }
  0xe8   :  { %v1010_v3 = vmul.f32 %v946_v18, %v882_v20  ;;  %v1031_v39 = vsel %vm1019_vm2, %v1009_v9, 0.0  ;;  %v1020_v43 = vsel %vm1019_vm2, %v1003_v41, 0.0  ;;  %v2214_v45 = vadd.f32 %v821_v25, %v805_v8 }
  0xe9   :  { %v868_v0 = vmul.f32 %v852_v48, %v788_v61  ;;  %v1022_v15 = vadd.f32 %v2095_v27, %v1020_v43  ;;  %v725_v36 = vsub.f32 0.0, %v2205_v21  ;;  %v678_v24 = vsub.f32 1.0, %v646_v11 }
  0xea   :  { %v450_v50 = vmul.f32 0.6931472, %v2116_v59  ;;  %v2220_v40 = vsel %vm1019_vm2, %v1010_v3, 0.0  ;;  %v662_v18 = vmul.f32 %v646_v11, %v448_v54  ;;  %vm631_vm6 = vcmp.eq.s32.totalorder %v2158_v29, %v1709_v13  ;;  %v618_v8 = vpop.permute.xlu0 %617 }
  0xeb   :  { %v884_v32 = vmul.f32 %v868_v0, %v788_v61  ;;  %v1024_v1 = vadd.f32 %v2111_v30, %v1022_v15  ;;  %v694_v46 = vmul.f32 %v678_v24, %v2098_v5  ;;  %v822_v48 = vmul.f32 0.75, %v678_v24 }
  0xec   :  { %v647_v27 = vsel %vm631_vm6, 0.90416664, %v2381_v51  ;;  %v742_v44 = vmul.f32 %v646_v11, %v2018_v16  ;;  %v806_v25 = vmul.f32 0.25, %v646_v11  ;;  %v452_v41 = vmul.f32 0.6931472, %v2134_v19 }
  0xed   :  { %v1012_v37 = vmul.f32 %v960_v12, %v884_v32  ;;  %v2228_v59 = vsub.f32 1.0, %v647_v27  ;;  %v1026_v62 = vadd.f32 %v2122_v35, %v1024_v1  ;;  %v710_v9 = vadd.f32 %v694_v46, %v662_v18 }
  0xee   :  { %v663_v20 = vmul.f32 %v647_v27, %v450_v50  ;;  %v2235_v5 = vmul.f32 %v647_v27, %v2043_v38  ;;  %vm632_vm7 = vcmp.eq.s32.totalorder %v604_v57, %v1709_v13  ;;  %v838_v3 = vadd.f32 %v822_v48, %v806_v25 }
  0xef   :  { %v695_v29 = vmul.f32 %v2228_v59, %v2130_v7  ;;  %v823_v30 = vmul.f32 0.75, %v2228_v59  ;;  %v1028_v61 = vadd.f32 %v2168_v60, %v1026_v62  ;;  %v807_v54 = vmul.f32 0.25, %v647_v27 }
  0xf0   :  { %v648_v35 = vsel %vm632_vm7, 0.90416664, %v2381_v51  ;;  %v2242_v11 = vsel %vm1019_vm2, %v1012_v37, 0.0  ;;  %v726_v19 = vsub.f32 0.0, %v710_v9  ;;  %v454_v12 = vmul.f32 0.6931472, %v2152_v2  ;;  %v953_v2 = vpop.permute.xlu0 %952 }
  0xf1   :  { %v711_v43 = vadd.f32 %v695_v29, %v663_v20  ;;  %v680_v7 = vsub.f32 1.0, %v648_v35  ;;  %v1030_v0 = vadd.f32 %v2189_v28, %v1028_v61  ;;  %v839_v15 = vadd.f32 %v823_v30, %v807_v54 }
  0xf2   :  { %vm633_vm8 = vcmp.eq.s32.totalorder %v611_v31, %v1709_v13  ;;  %v664_v57 = vmul.f32 %v648_v35, %v452_v41  ;;  %v744_v1 = vmul.f32 %v648_v35, %v2058_v23  ;;  %v808_v46 = vmul.f32 0.25, %v648_v35 }
  0xf3   :  { %v696_v60 = vmul.f32 %v680_v7, %v2160_v34  ;;  %v824_v50 = vmul.f32 0.75, %v680_v7  ;;  %v649_v32 = vsel %vm633_vm8, 0.90416664, %v2381_v51  ;;  %v727_v18 = vsub.f32 0.0, %v711_v43 }
  0xf4   :  { %v681_v48 = vsub.f32 1.0, %v649_v32  ;;  %v1032_v27 = vadd.f32 %v1031_v39, %v1030_v0  ;;  %v665_v25 = vmul.f32 %v649_v32, %v454_v12  ;;  %v758_v28 = vmul.f32 %v678_v24, %v468_v56 }
  0xf5   :  { %v712_v37 = vadd.f32 %v696_v60, %v664_v57  ;;  %v840_v62 = vadd.f32 %v824_v50, %v808_v46  ;;  %v745_v34 = vmul.f32 %v649_v32, %v2078_v63  ;;  %v809_v20 = vmul.f32 0.25, %v649_v32 }
  0xf6   :  { %v697_v31 = vmul.f32 %v681_v48, %v2186_v49  ;;  %v825_v9 = vmul.f32 0.75, %v681_v48  ;;  %v774_v41 = vadd.f32 %v758_v28, %v742_v44  ;;  %v854_v29 = vmul.f32 %v838_v3, %v726_v19 }
  0xf7   :  { %vm634_vm9 = vcmp.eq.s32.totalorder %v618_v8, %v1709_v13  ;;  %v456_v39 = vmul.f32 0.6931472, %v2182_v53  ;;  %v2407_v16 = vsub.f32 1.0, %v2394_v33  ;;  %v728_v24 = vsub.f32 0.0, %v712_v37  ;;  %v967_v33 = vpop.permute.xlu0 %966 }
  0xf8   :  { %v713_v30 = vadd.f32 %v697_v31, %v665_v25  ;;  %v650_v61 = vsel %vm634_vm9, 0.90416664, %v2381_v51  ;;  %v841_v54 = vadd.f32 %v825_v9, %v809_v20  ;;  %v790_v49 = vsub.f32 1.0, %v774_v41  ;;  %v974_v9 = vpop.permute.xlu1 %973 }
  0xf9   :  { %v755_v56 = vmul.f32 %v2126_v17, %v2407_v16  ;;  %v682_v35 = vsub.f32 1.0, %v650_v61  ;;  %v666_v43 = vmul.f32 %v650_v61, %v456_v39  ;;  %v746_v0 = vmul.f32 %v650_v61, %v2100_v58 }
  0xfa   :  { %v851_v8 = vmul.f32 %v2162_v10, %v723_v26  ;;  %v729_v53 = vsub.f32 0.0, %v713_v30  ;;  %v760_v17 = vmul.f32 %v680_v7, %v470_v14  ;;  %v870_v19 = vmul.f32 %v854_v29, %v790_v49  ;;  %v2411_v29 = vld [vmem:[#allocation12_spill] sm:$0xff] }
  0xfb   :  { %v771_v44 = vadd.f32 %v755_v56, %v2149_v4  ;;  %v698_v51 = vmul.f32 %v682_v35, %v2200_v52  ;;  %v826_v3 = vmul.f32 0.75, %v682_v35  ;;  %v810_v12 = vmul.f32 0.25, %v650_v61 }
  0xfc   :  { %v2408_v60 = vsub.f32 1.0, %v2406_v22  ;;  %v776_v32 = vadd.f32 %v760_v17, %v744_v1  ;;  %v856_v42 = vmul.f32 %v840_v62, %v728_v24  ;;  %v853_v10 = vmul.f32 %v2214_v45, %v725_v36  ;;  %v2413_v24 = vld [vmem:[#allocation10_spill] sm:$0xff]  ;;  %v1446_v17 = vld [vmem:[%s2339_s6] sm:$0xf] }
  0xfd   :  { %v787_v57 = vsub.f32 1.0, %v771_v44  ;;  %v714_v4 = vadd.f32 %v698_v51, %v666_v43  ;;  %v842_v26 = vadd.f32 %v826_v3, %v810_v12  ;;  %v759_v14 = vmul.f32 %v2228_v59, %v469_v47  ;;  %v1445_v3 = vld [vmem:[%s2338_s5] sm:$0xf] }
  0xfe   :  { %v757_v50 = vmul.f32 %v2191_v55, %v2408_v60  ;;  %v792_v46 = vsub.f32 1.0, %v776_v32  ;;  %v855_v22 = vmul.f32 %v839_v15, %v727_v18  ;;  %v2409_v55 = vsub.f32 1.0, %v2100_v58 }
  0xff   :  { %v867_v52 = vmul.f32 %v851_v8, %v787_v57  ;;  %v730_v7 = vsub.f32 0.0, %v714_v4  ;;  %v775_v21 = vadd.f32 %v759_v14, %v2235_v5  ;;  %v2410_v45 = vsub.f32 1.0, %v2078_v63  ;;  %v1062_v4 = vld [vmem:[%s2340_s7] sm:$0x1] }
 0x100   :  { %v773_v23 = vadd.f32 %v757_v50, %v2208_v6  ;;  %v762_v37 = vmul.f32 %v682_v35, %v2409_v55  ;;  %v886_v28 = vmul.f32 %v870_v19, %v790_v49  ;;  %v872_v62 = vmul.f32 %v856_v42, %v792_v46  ;;  %v981_v6 = vpop.permute.xlu0 %980 }
 0x101   :  { %v883_v1 = vmul.f32 %v867_v52, %v787_v57  ;;  %v761_v36 = vmul.f32 %v681_v48, %v2410_v45  ;;  %v858_v38 = vmul.f32 %v842_v26, %v730_v7  ;;  %v791_v20 = vsub.f32 1.0, %v775_v21  ;;  %v2415_v52 = vld [vmem:[#allocation6_spill] sm:$0xff] }
 0x102   :  { %v789_v25 = vsub.f32 1.0, %v773_v23  ;;  %v778_v31 = vadd.f32 %v762_v37, %v746_v0  ;;  %v1034_v58 = vadd.f32 %v2220_v40, %v1032_v27  ;;  %v857_v41 = vmul.f32 %v841_v54, %v729_v53  ;;  %v988_v27 = vpop.permute.xlu1 %987 }
 0x103   :  { %v1011_v47 = vmul.f32 %v953_v2, %v883_v1  ;;  %v777_v15 = vadd.f32 %v761_v36, %v745_v34  ;;  %v2412_v30 = vmax.f32 %v2411_v29, 1e-07  ;;  %v871_v48 = vmul.f32 %v855_v22, %v791_v20  ;;  %v2416_v22 = vld [vmem:[#allocation9_spill] sm:$0xff] }
 0x104   :  { %v869_v59 = vmul.f32 %v853_v10, %v789_v25  ;;  %v794_v18 = vsub.f32 1.0, %v778_v31  ;;  %v1014_v61 = vmul.f32 %v974_v9, %v886_v28  ;;  %v888_v56 = vmul.f32 %v872_v62, %v792_v46  ;;  %v995_v43 = vpop.permute.xlu0 %994 }
 0x105   :  { %1441 = vrcp.f32 %v2412_v30  ;;  %v1035_v63 = vsel %vm1019_vm2, %v1011_v47, 0.0  ;;  %v793_v39 = vsub.f32 1.0, %v777_v15  ;;  %v2414_v2 = vmax.f32 %v2413_v24, 1e-07 }
 0x106   :  { %v885_v5 = vmul.f32 %v869_v59, %v789_v25  ;;  %v1036_v16 = vadd.f32 %v1035_v63, %v1034_v58  ;;  %v887_v34 = vmul.f32 %v871_v48, %v791_v20  ;;  %v874_v35 = vmul.f32 %v858_v38, %v794_v18  ;;  %v1002_v50 = vpop.permute.xlu1 %1001 }
 0x107   :  { %1443 = vrcp.f32 %v2414_v2  ;;  %v873_v40 = vmul.f32 %v857_v41, %v793_v39  ;;  %v1041_v53 = vsel %vm1019_vm2, %v1014_v61, 0.0  ;;  %v1016_v19 = vmul.f32 %v988_v27, %v888_v56 }
 0x108   :  { %v1013_v49 = vmul.f32 %v967_v33, %v885_v5  ;;  %v1038_v54 = vadd.f32 %v2242_v11, %v1036_v16  ;;  %v1015_v44 = vmul.f32 %v981_v6, %v887_v34  ;;  %v1063_v33 = vsub.f32 %v1445_v3, %v1446_v17 }
 0x109   :  { %v889_v8 = vmul.f32 %v873_v40, %v793_v39  ;;  %v890_v12 = vmul.f32 %v874_v35, %v794_v18  ;;  %v1128_v32 = vsub.f32 %v2413_v24, %v2411_v29  ;;  %v1069_v23 = vrot.slane %v1062_v4, %v2415_v52 }
 0x10a   :  { %v1039_v0 = vsel %vm1019_vm2, %v1013_v49, 0.0  ;;  %v1043_v11 = vsel %vm1019_vm2, %v1015_v44, 0.0  ;;  %v1064_v26 = vand.u32 2147483647, %v1063_v33  ;;  %v1045_v14 = vsel %vm1019_vm2, %v1016_v19, 0.0 }
 0x10b   :  { %v1040_v51 = vadd.f32 %v1039_v0, %v1038_v54  ;;  %v1017_v57 = vmul.f32 %v995_v43, %v889_v8  ;;  %v1018_v7 = vmul.f32 %v1002_v50, %v890_v12  ;;  %v2417_v12 = vmov 0.0  }
 0x10c   :  { %v1071_v28 = vmul.f32 %v1069_v23, %v1064_v26  ;;  %v1221_v50 = vsel %vm1153_vm13, 1.0, %v2417_v12  ;;  %vm1176_vm0 = vcmp.eq.s32.totalorder %v1709_v13, 4  ;;  %v1224_v52 = vsel %vm1170_vm15, 1.0, %v2417_v12 }
 0x10d   :  { %v1042_v60 = vadd.f32 %v1041_v53, %v1040_v51  ;;  %v1047_v46 = vsel %vm1019_vm2, %v1017_v57, 0.0  ;;  %v1049_v36 = vsel %vm1019_vm2, %v1018_v7, 0.0  ;;  %v1222_v57 = vsel %vm1158_vm12, 1.0, %v2417_v12 }
 0x10e   :  { %v1073_v38 = vsel %vm1072_vm10, %v1071_v28, 0.0 }
 0x10f   :  { %v1442_v42 = vpop.eup %1441  ;;  %v1044_v10 = vadd.f32 %v1043_v11, %v1042_v60 }
 0x110   :  { %v1117_v55 = vmul.f32 %v1442_v42, %v2416_v22 }
 0x111   :  { %v1444_v37 = vpop.eup %1443  ;;  %v1046_v1 = vadd.f32 %v1045_v14, %v1044_v10 }
 0x112   :  { %v1129_v25 = vmul.f32 %v1444_v37, %v1128_v32 }
 0x113   :  { %v1048_v21 = vadd.f32 %v1047_v46, %v1046_v1  ;;  %v1225_v46 = vsel %vm1176_vm0, 1.0, %v2417_v12  ;;  %v2418_v1 = vld [vmem:[#allocation5_spill] sm:$0xff] }
 0x114   :  { %v1130_v45 = vsub.f32 %v1117_v55, %v1129_v25  ;;  %vm1150_vm1 = vcmp.eq.s32.totalorder %v2418_v1, 0 }
 0x115   :  { %v1050_v62 = vadd.f32 %v1049_v36, %v1048_v21 }
 0x116   :  { %v1131_v6 = vsub.f32 1.0, %v1130_v45  ;;  %v1220_v45 = vsel %vm1150_vm1, 1.0, %v2417_v12 }
 0x117   :  { %1051 = vadd.xlane.f32.xlu0 %v1050_v62 }
 0x118   :  { %v1132_v31 = vmul.f32 %v1131_v6, %v1062_v4  ;;  %v1223_v4 = vsel %vm1164_vm14, 1.0, %v2417_v12 }
 0x11a   :  { %v1134_v9 = vsel %vm1133_vm11, %v1132_v31, 0.0 }
 0x11b   :  { %1135 = vadd.xlane.f32.xlu1 %v1134_v9  ;;  %1074 = vadd.xlane.f32.xlu0 %v1073_v38 }
 0x121   :  { %v161_v47 = vpop.xlane.xlu1 %160 }
 0x122   :  { %v162_v59 = vrot.slane %v161_v47, 4 }
 0x124   :  { %v163_v20 = vadd.f32 %v162_v59, %v161_v47 }
 0x126   :  { %v164_v15 = vrot.slane %v163_v20, 2 }
 0x128   :  { %v165_v41 = vadd.f32 %v164_v15, %v163_v20 }
 0x12a   :  { %v166_v63 = vrot.slane %v165_v41, 1 }
 0x12c   :  { %v167_v39 = vadd.f32 %v166_v63, %v165_v41 }
 0x130   :  { %v149_v58 = vpop.xlane.xlu0 %148 }
 0x131   :  { %v150_v18 = vrot.slane %v149_v58, 4 }
 0x133   :  { %v151_v29 = vadd.f32 %v150_v18, %v149_v58 }
 0x135   :  { %v152_v30 = vrot.slane %v151_v29, 2 }
 0x137   :  { %v153_v5 = vadd.f32 %v152_v30, %v151_v29 }
 0x139   :  { %v154_v48 = vrot.slane %v153_v5, 1 }
 0x13b   :  { %v155_v61 = vadd.f32 %v154_v48, %v153_v5 }
 0x13d   :  { %1279 = vpush %v155_v61 }
 0x13e   :  { %1281 = vpush %v167_v39 }
 0x16e   :  { %s1280_s5 = spop %1279 }
 0x16f   :  { %s1282_s6 = spop %1281  ;;  %v1161_v60 = vstv %s1280_s5 }
 0x170   :  { %v1167_v32 = vstv %s1282_s6  ;;  %v1162_v10 = vmul.f32 %v1222_v57, %v1161_v60 }
 0x171   :  { %v1168_v23 = vmul.f32 %v1223_v4, %v1167_v32 }
 0x1a4   :  { %v1052_v16 = vpop.xlane.xlu0 %1051 }
 0x1a5   :  { %v1053_v56 = vrot.slane %v1052_v16, 4 }
 0x1a7   :  { %v1054_v24 = vadd.f32 %v1053_v56, %v1052_v16 }
 0x1a8   :  { %v1136_v2 = vpop.xlane.xlu1 %1135  ;;  %v1075_v49 = vpop.xlane.xlu0 %1074 }
 0x1a9   :  { %v1137_v34 = vrot.slane %v1136_v2, 4  ;;  %v1055_v35 = vrot.slane %v1054_v24, 2  ;;  %v1076_v40 = vrot.slane %v1075_v49, 4 }
 0x1ab   :  { %v1138_v27 = vadd.f32 %v1137_v34, %v1136_v2  ;;  %v1077_v54 = vadd.f32 %v1076_v40, %v1075_v49  ;;  %v1056_v43 = vadd.f32 %v1055_v35, %v1054_v24 }
 0x1ad   :  { %v1139_v0 = vrot.slane %v1138_v27, 2  ;;  %v1078_v44 = vrot.slane %v1077_v54, 2  ;;  %v1057_v8 = vrot.slane %v1056_v43, 1 }
 0x1af   :  { %v1140_v53 = vadd.f32 %v1139_v0, %v1138_v27  ;;  %v1079_v51 = vadd.f32 %v1078_v44, %v1077_v54  ;;  %v1058_v3 = vadd.f32 %v1057_v8, %v1056_v43 }
 0x1b1   :  { %1283 = vpush %v1058_v3  ;;  %v1080_v17 = vrot.slane %v1079_v51, 1  ;;  %v1141_v33 = vrot.slane %v1140_v53, 1 }
 0x1b3   :  { %v1081_v19 = vadd.f32 %v1080_v17, %v1079_v51  ;;  %v1142_v11 = vadd.f32 %v1141_v33, %v1140_v53 }
 0x1b5   :  { %1285 = vpush %v1081_v19 }
 0x1b6   :  { %1287 = vpush %v1142_v11 }
 0x1e2   :  { %s1284_s7 = spop %1283 }
 0x1e3   :  { %v1156_v42 = vstv %s1284_s7 }
 0x1e4   :  { %v1157_v26 = vmul.f32 %v1221_v50, %v1156_v42 }
 0x1e6   :  { %v1163_v14 = vadd.f32 %v1162_v10, %v1157_v26  ;;  %s1286_s20 = spop %1285 }
 0x1e7   :  { %v1173_v7 = vstv %s1286_s20  ;;  %s1288_s4 = spop %1287 }
 0x1e8   :  { %v1169_v22 = vadd.f32 %v1168_v23, %v1163_v14  ;;  %v1174_v55 = vmul.f32 %v1224_v52, %v1173_v7  ;;  %v1179_v37 = vstv %s1288_s4 }
 0x1e9   :  { %v1180_v21 = vmul.f32 %v1225_v46, %v1179_v37 }
 0x1ea   :  { %v1175_v25 = vadd.f32 %v1174_v55, %v1169_v22 }
 0x1ec   :  { %v1181_v13 = vadd.f32 %v1180_v21, %v1175_v25 }
 0x1ee   :  { %v1182_v36 = vmul.f32 %v1220_v45, %v1181_v13 }
 0x1f0   :  { %1183 = vst [vmem:[#allocation2] sm:$0xff] %v1182_v36 }
 0x1f1   :  { %1458 = shalt.err (!%p1455_p4)
}
 0x1f2   :  { %s1459_s26 = scalar_lea.hbm %s2341_s8, 128 }
 0x1f3   :  { %p1460_p5 = scmp.ne.s32.totalorder %s2341_s8, %s1459_s26  ;;  %p1463_p6 = scmp.lt.u32.totalorder %s1459_s26, %s2341_s8 }
 0x1f5   :  { %p1465_p7 = pnand %p1463_p6, %p1460_p5 }
 0x1f7   :  { %1468 = shalt.err (!%p1465_p7)
}
 0x1f8   :  { %1193 = dma.vmem_to_hbm [thread:$0]  %s1191_s22, 128, %s2341_s8, [#allocation3]  }
 0x1f9   :  { %1469 = dma.done.wait [#allocation3], 128  }
 0x1fa   :  { %1470 = vsyncadd [#allocation3], 4294967168 }
 0x1fb   :  { %1197 = vsyncpa [#allocation3], 1 }

</bundles_post_ra>
